<compile_context>
chip_gen: v6e
topology: v6e:2x2x1
jax: 0.10.0
libtpu: 0.0.40
codegen_flags: <defaults>
</compile_context>

<pallas_src>
import jax
import jax.numpy as jnp
import numpy as np
from jax.experimental import pallas as pl
from jax.experimental.pallas import tpu as pltpu

# Parameter-slab row layout (one [16,128] f32 slab; scalars broadcast across lanes,
# per-output-channel vectors zero-padded to 128 lanes).
_ROW_W1, _ROW_BW1, _ROW_U1, _ROW_BU1 = 0, 1, 2, 3
_ROW_W2, _ROW_BW2, _ROW_U2, _ROW_BU2 = 4, 5, 6, 7
_ROW_FCW, _ROW_BFC = 8, 9
_SLAB_ROWS, _LANES = 16, 128
_OUT_ROWS = 8


def _ggcn_kernel(x_ref, adj_ref, p_ref, out_ref):
    """One grid step = GB graphs: x_ref (GB,N,1), adj_ref (GB,N,N), out_ref (GB,8,128)."""
    p = p_ref[...]                                   # [16,128] parameter slab (resident)
    w1, bw1 = p[_ROW_W1], p[_ROW_BW1]                # (128,) scalar-broadcast rows
    u1, bu1 = p[_ROW_U1], p[_ROW_BU1]
    w2, bw2 = p[_ROW_W2], p[_ROW_BW2]                # (128,) zero-padded beyond COUT
    u2, bu2 = p[_ROW_U2], p[_ROW_BU2]
    fcw, bfc = p[_ROW_FCW], p[_ROW_BFC]

    gb, n, _ = x_ref.shape
    inv_n = jnp.float32(1.0 / n)
    sub = jax.lax.broadcasted_iota(jnp.int32, (_OUT_ROWS, _LANES), 0)  # hoisted, reused

    def one_graph(g, carry):
        x = x_ref[g]                                 # [N, 1]  f32
        adj = adj_ref[g].astype(jnp.float32)         # [N, N]  (bf16 in HBM -> f32, lossless 0/1)

        # ---- layer 1: scalar weights -> pure VPU broadcast-MADs; one MXU matmul.
        h1 = x * w1 + bw1                            # [N,128] (all lanes identical)
        m1 = jnp.dot(adj, h1, preferred_element_type=jnp.float32)
        r1 = jax.nn.sigmoid(x * u1 + bu1)
        x1 = jnp.maximum(m1 * r1, 0.0)               # [N,128]

        # ---- layer 2: vector weights (zero-padded) -> VPU; one MXU matmul.
        h2 = x1 * w2 + bw2                           # padding lanes stay exactly 0
        m2 = jnp.dot(adj, h2, preferred_element_type=jnp.float32)
        r2 = jax.nn.sigmoid(x1 * u2 + bu2)
        x2 = jnp.maximum(m2 * r2, 0.0)               # [N,128]; lanes >= COUT are 0

        # ---- readout (mean over nodes, fc as a lane reduction on the XLU).
        xm = jnp.sum(x2, axis=0, keepdims=True) * inv_n           # [1,128]
        y = jnp.sum(xm * fcw, axis=1, keepdims=True) + bfc        # [1,128], every lane == y

        # ---- gates: fc output fed back through conv1.U / conv2.U (VPU only).
        g1 = jax.nn.sigmoid(y * u1 + bu1)            # [1,128], every lane == gate1
        g2 = jax.nn.sigmoid(y * u2 + bu2)            # [1,128], lanes < COUT valid

        # Build the [8,128] result in registers (VPU selects) and do one dense store:
        # row0 = y, row1 = gate1, row2 = gate2, rows 3..7 = 0.
        tile = jnp.where(sub == 0, y,
               jnp.where(sub == 1, g1,
               jnp.where(sub == 2, g2, jnp.float32(0.0))))
        out_ref[g] = tile
        return carry

    # Unrolled so the LLO scheduler can interleave across graphs while keeping only
    # one graph's temporaries live at a time.
    jax.lax.fori_loop(0, gb, one_graph, 0, unroll=True)


def pack_ggcn_params(params):
    """Pack all Linear weights/biases into one [16,128] f32 slab (single resident DMA).

    Call ONCE outside the hot loop (it's ~12 tiny XLA ops); reuse the result for every
    forward call.  Returns (pslab, hidden_channels, out_channels).
    """
    (w1t, bw1, u1t, bu1, w2t, bw2, u2t, bu2, fct, bfc) = params
    cin, hid = w1t.shape
    cout = w2t.shape[1]
    # The PyTorch forward only type-checks with in_channels == hidden_channels == 1
    # (the fc output of size 1 is fed back through conv1.U / conv2.U).
    assert cin == 1 and hid == 1, "forward requires in_channels == hidden_channels == 1"
    assert cout <= _LANES, "out_channels must fit in one lane tile"

    def bcast(v):  # scalar -> broadcast row
        return jnp.broadcast_to(jnp.asarray(v, jnp.float32).reshape(1, 1), (1, _LANES))

    def pad(v):    # [k] -> zero-padded row
        v = jnp.asarray(v, jnp.float32).reshape(-1)
        return jnp.pad(v, (0, _LANES - v.shape[0])).reshape(1, _LANES)

    rows = [
        bcast(w1t), bcast(bw1), bcast(u1t), bcast(bu1),          # rows 0-3
        pad(w2t[0]), pad(bw2[0]), pad(u2t[0]), pad(bu2[0]),      # rows 4-7
        pad(fct[:, 0]), bcast(bfc),                              # rows 8-9
    ]
    rows += [jnp.zeros((1, _LANES), jnp.float32)] * (_SLAB_ROWS - len(rows))
    return jnp.concatenate(rows, axis=0), hid, cout              # ([16,128], hid, cout)


def gated_graph_conv_net(x, adj, packed_params, *, graphs_per_step=8,
                         adj_storage_dtype=jnp.bfloat16):
    """x: [B,N,1] or [N,1]; adj: [B,N,N] or [N,N]. Returns (y, gate1, gate2).

    adj_storage_dtype=bf16 halves the dominant N^2 HBM traffic and is lossless for
    0/1 adjacencies; pass jnp.float32 for arbitrarily-weighted graphs.
    """
    pslab, hid, cout = packed_params

    squeeze = x.ndim == 2
    if squeeze:
        x, adj = x[None], adj[None]
    b, n, cin = x.shape
    assert cin == 1 and hid == 1, "forward requires in_channels == hidden_channels == 1"

    x = x.astype(jnp.float32)
    adj = adj.astype(adj_storage_dtype)

    # Clamp graphs-per-step so the double-buffered per-step footprint stays <= ~24 MiB
    # (sized against v7x's 64 MiB VMEM; scoped limit raised explicitly to 32 MiB below).
    adj_item = jnp.dtype(adj_storage_dtype).itemsize
    per_graph_bytes = 2 * (n * n * adj_item + n * cin * 4 + _OUT_ROWS * _LANES * 4)
    budget = 24 * 1024 * 1024
    gb = max(1, min(graphs_per_step, b, budget // max(per_graph_bytes, 1)))

    steps = pl.cdiv(b, gb)
    b_pad = steps * gb
    if b_pad != b:
        # Zero-padded graphs are computed and discarded; zero adj keeps them NaN-free.
        x = jnp.pad(x, ((0, b_pad - b), (0, 0), (0, 0)))
        adj = jnp.pad(adj, ((0, b_pad - b), (0, 0), (0, 0)))

    cost = pl.CostEstimate(
        flops=int(b_pad * (4 * n * n * _LANES + 12 * n * _LANES)),
        transcendentals=int(b_pad * (2 * n * _LANES + 2 * _LANES)),
        bytes_accessed=int(b_pad * (adj_item * n * n + 4 * n * cin
                                    + 4 * _OUT_ROWS * _LANES)
                           + 4 * _SLAB_ROWS * _LANES),
    )

    out = pl.pallas_call(
        _ggcn_kernel,
        grid=(steps,),
        in_specs=[
            pl.BlockSpec((gb, n, cin), lambda i: (i, 0, 0)),         # x   (1 DMA / step)
            pl.BlockSpec((gb, n, n), lambda i: (i, 0, 0)),           # adj (1 DMA / step, bf16)
            pl.BlockSpec((_SLAB_ROWS, _LANES), lambda i: (0, 0)),    # params (resident)
        ],
        out_specs=pl.BlockSpec((gb, _OUT_ROWS, _LANES), lambda i: (i, 0, 0)),
        out_shape=jax.ShapeDtypeStruct((b_pad, _OUT_ROWS, _LANES), jnp.float32),
        compiler_params=pltpu.CompilerParams(
            dimension_semantics=("parallel",),          # megacore sharding on v7x
            vmem_limit_bytes=32 * 1024 * 1024,          # explicit (v5e default is 16 MiB)
        ),
        cost_estimate=cost,
    )(x, adj, pslab)

    y = out[:b, 0, 0:1]          # [B, 1]
    gate1 = out[:b, 1, 0:hid]    # [B, hid]
    gate2 = out[:b, 2, 0:cout]   # [B, cout]
    if squeeze:
        return y[0], gate1[0], gate2[0]
    return y, gate1, gate2


def _reference(x, adj, params):
    """Pure-JAX reference mirroring the PyTorch forward (single graph)."""
    (w1t, bw1, u1t, bu1, w2t, bw2, u2t, bu2, fct, bfc) = params

    def layer(xx, wt, bw, ut, bu):
        h = xx @ wt + bw
        m = adj @ h
        r = jax.nn.sigmoid(xx @ ut + bu)
        return m * r

    x1 = jax.nn.relu(layer(x, w1t, bw1[0], u1t, bu1[0]))
    x2 = jax.nn.relu(layer(x1, w2t, bw2[0], u2t, bu2[0]))
    xm = jnp.mean(x2, axis=0)
    y = xm @ fct + bfc[0]
    g1 = jax.nn.sigmoid(y @ u1t + bu1[0])
    g2 = jax.nn.sigmoid(y @ u2t + bu2[0])
    return y, g1, g2


if __name__ == "__main__":
    # Shapes consistent with the module's constraints:
    # in_channels = 1, hidden_channels = 1 (required by the forward), out_channels = 8.
    B, N, CIN, HID, COUT = 8, 16, 1, 1, 8
    GB = 4   # 4 graphs per grid step -> grid=(2,): even split for v7x's two TensorCores

    key = jax.random.PRNGKey(0)
    ks = jax.random.split(key, 12)

    x = jax.random.normal(ks[0], (B, N, CIN), dtype=jnp.float32)
    adj = (jax.random.uniform(ks[1], (B, N, N)) < 0.3).astype(jnp.float32)

    def linear_params(kw, kb, fan_in, fan_out):
        bound = 1.0 / np.sqrt(fan_in)
        wt = jax.random.uniform(kw, (fan_in, fan_out), minval=-bound, maxval=bound,
                                dtype=jnp.float32)          # already [in, out] (W.T)
        b = jax.random.uniform(kb, (1, fan_out), minval=-bound, maxval=bound,
                               dtype=jnp.float32)
        return wt, b

    w1t, bw1 = linear_params(ks[2], ks[3], CIN, HID)    # conv1.W
    u1t, bu1 = linear_params(ks[4], ks[5], CIN, HID)    # conv1.U
    w2t, bw2 = linear_params(ks[6], ks[7], HID, COUT)   # conv2.W
    u2t, bu2 = linear_params(ks[8], ks[9], HID, COUT)   # conv2.U
    fct, bfc = linear_params(ks[10], ks[11], COUT, 1)   # fc

    params = (w1t, bw1, u1t, bu1, w2t, bw2, u2t, bu2, fct, bfc)

    # Pack once (hoisted out of the per-call path), reuse for every forward call.
    packed = pack_ggcn_params(params)

    y, gate1, gate2 = gated_graph_conv_net(x, adj, packed, graphs_per_step=GB)
    jax.block_until_ready((y, gate1, gate2))

    # Correctness check against a pure-JAX reference of the PyTorch forward, per graph.
    for g in range(B):
        y_ref, g1_ref, g2_ref = _reference(x[g], adj[g], params)
        np.testing.assert_allclose(np.asarray(y[g]), np.asarray(y_ref),
                                   rtol=1e-5, atol=1e-5)
        np.testing.assert_allclose(np.asarray(gate1[g]), np.asarray(g1_ref),
                                   rtol=1e-5, atol=1e-5)
        np.testing.assert_allclose(np.asarray(gate2[g]), np.asarray(g2_ref),
                                   rtol=1e-5, atol=1e-5)

    print("KERNEL_OK")
</pallas_src>

<mosaic_0001>
module attributes {stable_mosaic.version = 11 : i64} {
  func.func @_ggcn_kernel(%arg0: i32, %arg1: memref<4x16x1xf32, #tpu.memory_space<vmem>>, %arg2: memref<4x16x16xbf16, #tpu.memory_space<vmem>>, %arg3: memref<16x128xf32, #tpu.memory_space<vmem>>, %arg4: memref<4x8x128xf32, #tpu.memory_space<vmem>>) attributes {dimension_semantics = [#tpu.dimension_semantics<parallel>], iteration_bounds = array<i64: 2>, scalar_prefetch = 0 : i64, scratch_operands = 0 : i64, tpu.core_type = #tpu.core_type<tc>, window_params = [{transform_indices = @transform_0, window_bounds = array<i64: 4, 16, 1>}, {transform_indices = @transform_1, window_bounds = array<i64: 4, 16, 16>}, {pipeline_mode = #tpu.pipeline_mode<synchronous>, transform_indices = @transform_2, window_bounds = array<i64: 16, 128>}, {transform_indices = @transform_3, window_bounds = array<i64: 4, 8, 128>}]} {
    %c0 = arith.constant 0 : index
    %c0_0 = arith.constant 0 : index
    %0 = vector.load %arg3[%c0, %c0_0] : memref<16x128xf32, #tpu.memory_space<vmem>>, vector<16x128xf32>
    %1 = vector.extract_strided_slice %0 {offsets = [0, 0], sizes = [1, 128], strides = [1, 1]} : vector<16x128xf32> to vector<1x128xf32>
    %2 = vector.shape_cast %1 : vector<1x128xf32> to vector<128xf32>
    %3 = vector.extract_strided_slice %0 {offsets = [1, 0], sizes = [1, 128], strides = [1, 1]} : vector<16x128xf32> to vector<1x128xf32>
    %4 = vector.shape_cast %3 : vector<1x128xf32> to vector<128xf32>
    %5 = vector.extract_strided_slice %0 {offsets = [2, 0], sizes = [1, 128], strides = [1, 1]} : vector<16x128xf32> to vector<1x128xf32>
    %6 = vector.shape_cast %5 : vector<1x128xf32> to vector<128xf32>
    %7 = vector.extract_strided_slice %0 {offsets = [3, 0], sizes = [1, 128], strides = [1, 1]} : vector<16x128xf32> to vector<1x128xf32>
    %8 = vector.shape_cast %7 : vector<1x128xf32> to vector<128xf32>
    %9 = vector.extract_strided_slice %0 {offsets = [4, 0], sizes = [1, 128], strides = [1, 1]} : vector<16x128xf32> to vector<1x128xf32>
    %10 = vector.shape_cast %9 : vector<1x128xf32> to vector<128xf32>
    %11 = vector.extract_strided_slice %0 {offsets = [5, 0], sizes = [1, 128], strides = [1, 1]} : vector<16x128xf32> to vector<1x128xf32>
    %12 = vector.shape_cast %11 : vector<1x128xf32> to vector<128xf32>
    %13 = vector.extract_strided_slice %0 {offsets = [6, 0], sizes = [1, 128], strides = [1, 1]} : vector<16x128xf32> to vector<1x128xf32>
    %14 = vector.shape_cast %13 : vector<1x128xf32> to vector<128xf32>
    %15 = vector.extract_strided_slice %0 {offsets = [7, 0], sizes = [1, 128], strides = [1, 1]} : vector<16x128xf32> to vector<1x128xf32>
    %16 = vector.shape_cast %15 : vector<1x128xf32> to vector<128xf32>
    %17 = vector.extract_strided_slice %0 {offsets = [8, 0], sizes = [1, 128], strides = [1, 1]} : vector<16x128xf32> to vector<1x128xf32>
    %18 = vector.shape_cast %17 : vector<1x128xf32> to vector<128xf32>
    %19 = vector.extract_strided_slice %0 {offsets = [9, 0], sizes = [1, 128], strides = [1, 1]} : vector<16x128xf32> to vector<1x128xf32>
    %20 = vector.shape_cast %19 : vector<1x128xf32> to vector<128xf32>
    %21 = tpu.iota {dimensions = array<i32: 0>} : vector<8x128xi32>
    %cst = arith.constant 6.250000e-02 : f32
    %c0_i32 = arith.constant 0 : i32
    %22 = arith.index_cast %c0_i32 : i32 to index
    %c0_1 = arith.constant 0 : index
    %c0_2 = arith.constant 0 : index
    %23 = vector.load %arg1[%22, %c0_1, %c0_2] : memref<4x16x1xf32, #tpu.memory_space<vmem>>, vector<1x16x1xf32>
    %24 = vector.shape_cast %23 : vector<1x16x1xf32> to vector<16x1xf32>
    %25 = arith.index_cast %c0_i32 : i32 to index
    %c0_3 = arith.constant 0 : index
    %c0_4 = arith.constant 0 : index
    %26 = vector.load %arg2[%25, %c0_3, %c0_4] : memref<4x16x16xbf16, #tpu.memory_space<vmem>>, vector<1x16x16xbf16>
    %27 = vector.shape_cast %26 : vector<1x16x16xbf16> to vector<16x16xbf16>
    %28 = arith.extf %27 : vector<16x16xbf16> to vector<16x16xf32>
    %29 = vector.shape_cast %2 : vector<128xf32> to vector<1x128xf32>
    %30 = vector.broadcast %24 : vector<16x1xf32> to vector<16x128xf32>
    %31 = vector.broadcast %29 : vector<1x128xf32> to vector<16x128xf32>
    %32 = arith.mulf %30, %31 : vector<16x128xf32>
    %33 = vector.shape_cast %4 : vector<128xf32> to vector<1x128xf32>
    %34 = vector.broadcast %33 : vector<1x128xf32> to vector<16x128xf32>
    %35 = arith.addf %32, %34 : vector<16x128xf32>
    %cst_5 = arith.constant dense<0.000000e+00> : vector<16x128xf32>
    %36 = tpu.matmul %28, %35, %cst_5 {dimension_numbers = #tpu.dot_dimension_numbers<[1], [0], [0], [1], [0, 0, 1, 1], [], []>} : vector<16x16xf32>, vector<16x128xf32>, vector<16x128xf32> -> vector<16x128xf32>
    %37 = vector.shape_cast %6 : vector<128xf32> to vector<1x128xf32>
    %38 = vector.broadcast %24 : vector<16x1xf32> to vector<16x128xf32>
    %39 = vector.broadcast %37 : vector<1x128xf32> to vector<16x128xf32>
    %40 = arith.mulf %38, %39 : vector<16x128xf32>
    %41 = vector.shape_cast %8 : vector<128xf32> to vector<1x128xf32>
    %42 = vector.broadcast %41 : vector<1x128xf32> to vector<16x128xf32>
    %43 = arith.addf %40, %42 : vector<16x128xf32>
    %44 = arith.negf %43 : vector<16x128xf32>
    %45 = math.exp %44 : vector<16x128xf32>
    %cst_6 = arith.constant 1.000000e+00 : f32
    %46 = vector.broadcast %cst_6 : f32 to vector<16x128xf32>
    %47 = arith.addf %46, %45 : vector<16x128xf32>
    %48 = arith.divf %46, %47 : vector<16x128xf32>
    %49 = arith.mulf %36, %48 : vector<16x128xf32>
    %cst_7 = arith.constant 0.000000e+00 : f32
    %50 = vector.broadcast %cst_7 : f32 to vector<16x128xf32>
    %51 = arith.maximumf %49, %50 : vector<16x128xf32>
    %52 = vector.shape_cast %10 : vector<128xf32> to vector<1x128xf32>
    %53 = vector.broadcast %52 : vector<1x128xf32> to vector<16x128xf32>
    %54 = arith.mulf %51, %53 : vector<16x128xf32>
    %55 = vector.shape_cast %12 : vector<128xf32> to vector<1x128xf32>
    %56 = vector.broadcast %55 : vector<1x128xf32> to vector<16x128xf32>
    %57 = arith.addf %54, %56 : vector<16x128xf32>
    %cst_8 = arith.constant dense<0.000000e+00> : vector<16x128xf32>
    %58 = tpu.matmul %28, %57, %cst_8 {dimension_numbers = #tpu.dot_dimension_numbers<[1], [0], [0], [1], [0, 0, 1, 1], [], []>} : vector<16x16xf32>, vector<16x128xf32>, vector<16x128xf32> -> vector<16x128xf32>
    %59 = vector.shape_cast %14 : vector<128xf32> to vector<1x128xf32>
    %60 = vector.broadcast %59 : vector<1x128xf32> to vector<16x128xf32>
    %61 = arith.mulf %51, %60 : vector<16x128xf32>
    %62 = vector.shape_cast %16 : vector<128xf32> to vector<1x128xf32>
    %63 = vector.broadcast %62 : vector<1x128xf32> to vector<16x128xf32>
    %64 = arith.addf %61, %63 : vector<16x128xf32>
    %65 = arith.negf %64 : vector<16x128xf32>
    %66 = math.exp %65 : vector<16x128xf32>
    %cst_9 = arith.constant 1.000000e+00 : f32
    %67 = vector.broadcast %cst_9 : f32 to vector<16x128xf32>
    %68 = arith.addf %67, %66 : vector<16x128xf32>
    %69 = arith.divf %67, %68 : vector<16x128xf32>
    %70 = arith.mulf %58, %69 : vector<16x128xf32>
    %cst_10 = arith.constant 0.000000e+00 : f32
    %71 = vector.broadcast %cst_10 : f32 to vector<16x128xf32>
    %72 = arith.maximumf %70, %71 : vector<16x128xf32>
    %cst_11 = arith.constant dense<0.000000e+00> : vector<128xf32>
    %73 = vector.multi_reduction <add>, %72, %cst_11 [0] : vector<16x128xf32> to vector<128xf32>
    %74 = vector.shape_cast %73 : vector<128xf32> to vector<1x128xf32>
    %75 = vector.broadcast %cst : f32 to vector<1x128xf32>
    %76 = arith.mulf %74, %75 : vector<1x128xf32>
    %77 = vector.shape_cast %18 : vector<128xf32> to vector<1x128xf32>
    %78 = arith.mulf %76, %77 : vector<1x128xf32>
    %cst_12 = arith.constant dense<0.000000e+00> : vector<1xf32>
    %79 = vector.multi_reduction <add>, %78, %cst_12 [1] : vector<1x128xf32> to vector<1xf32>
    %80 = vector.shape_cast %79 : vector<1xf32> to vector<1x1xf32>
    %81 = vector.shape_cast %20 : vector<128xf32> to vector<1x128xf32>
    %82 = vector.broadcast %80 : vector<1x1xf32> to vector<1x128xf32>
    %83 = arith.addf %82, %81 : vector<1x128xf32>
    %84 = vector.shape_cast %6 : vector<128xf32> to vector<1x128xf32>
    %85 = arith.mulf %83, %84 : vector<1x128xf32>
    %86 = vector.shape_cast %8 : vector<128xf32> to vector<1x128xf32>
    %87 = arith.addf %85, %86 : vector<1x128xf32>
    %88 = arith.negf %87 : vector<1x128xf32>
    %89 = math.exp %88 : vector<1x128xf32>
    %cst_13 = arith.constant 1.000000e+00 : f32
    %90 = vector.broadcast %cst_13 : f32 to vector<1x128xf32>
    %91 = arith.addf %90, %89 : vector<1x128xf32>
    %92 = arith.divf %90, %91 : vector<1x128xf32>
    %93 = vector.shape_cast %14 : vector<128xf32> to vector<1x128xf32>
    %94 = arith.mulf %83, %93 : vector<1x128xf32>
    %95 = vector.shape_cast %16 : vector<128xf32> to vector<1x128xf32>
    %96 = arith.addf %94, %95 : vector<1x128xf32>
    %97 = arith.negf %96 : vector<1x128xf32>
    %98 = math.exp %97 : vector<1x128xf32>
    %cst_14 = arith.constant 1.000000e+00 : f32
    %99 = vector.broadcast %cst_14 : f32 to vector<1x128xf32>
    %100 = arith.addf %99, %98 : vector<1x128xf32>
    %101 = arith.divf %99, %100 : vector<1x128xf32>
    %c0_i32_15 = arith.constant 0 : i32
    %102 = vector.broadcast %c0_i32_15 : i32 to vector<8x128xi32>
    %103 = arith.cmpi eq, %21, %102 : vector<8x128xi32>
    %c1_i32 = arith.constant 1 : i32
    %104 = vector.broadcast %c1_i32 : i32 to vector<8x128xi32>
    %105 = arith.cmpi eq, %21, %104 : vector<8x128xi32>
    %c2_i32 = arith.constant 2 : i32
    %106 = vector.broadcast %c2_i32 : i32 to vector<8x128xi32>
    %107 = arith.cmpi eq, %21, %106 : vector<8x128xi32>
    %cst_16 = arith.constant 0.000000e+00 : f32
    %108 = vector.shape_cast %101 : vector<1x128xf32> to vector<1x128xf32>
    %109 = vector.broadcast %108 : vector<1x128xf32> to vector<8x128xf32>
    %110 = vector.broadcast %cst_16 : f32 to vector<8x128xf32>
    %111 = arith.select %107, %109, %110 : vector<8x128xi1>, vector<8x128xf32>
    %112 = vector.shape_cast %92 : vector<1x128xf32> to vector<1x128xf32>
    %113 = vector.broadcast %112 : vector<1x128xf32> to vector<8x128xf32>
    %114 = arith.select %105, %113, %111 : vector<8x128xi1>, vector<8x128xf32>
    %115 = vector.shape_cast %83 : vector<1x128xf32> to vector<1x128xf32>
    %116 = vector.broadcast %115 : vector<1x128xf32> to vector<8x128xf32>
    %117 = arith.select %103, %116, %114 : vector<8x128xi1>, vector<8x128xf32>
    %118 = arith.index_cast %c0_i32 : i32 to index
    %c0_17 = arith.constant 0 : index
    %c0_18 = arith.constant 0 : index
    %119 = vector.load %arg4[%118, %c0_17, %c0_18] : memref<4x8x128xf32, #tpu.memory_space<vmem>>, vector<1x8x128xf32>
    %120 = vector.shape_cast %119 : vector<1x8x128xf32> to vector<8x128xf32>
    %121 = vector.shape_cast %117 : vector<8x128xf32> to vector<1x8x128xf32>
    tpu.vector_store %arg4[%118, %c0_17, %c0_18], %121 {strides = array<i32>} : memref<4x8x128xf32, #tpu.memory_space<vmem>>, vector<1x8x128xf32>,
    %c1_i32_19 = arith.constant 1 : i32
    %122 = arith.index_cast %c1_i32_19 : i32 to index
    %c0_20 = arith.constant 0 : index
    %c0_21 = arith.constant 0 : index
    %123 = vector.load %arg1[%122, %c0_20, %c0_21] : memref<4x16x1xf32, #tpu.memory_space<vmem>>, vector<1x16x1xf32>
    %124 = vector.shape_cast %123 : vector<1x16x1xf32> to vector<16x1xf32>
    %125 = arith.index_cast %c1_i32_19 : i32 to index
    %c0_22 = arith.constant 0 : index
    %c0_23 = arith.constant 0 : index
    %126 = vector.load %arg2[%125, %c0_22, %c0_23] : memref<4x16x16xbf16, #tpu.memory_space<vmem>>, vector<1x16x16xbf16>
    %127 = vector.shape_cast %126 : vector<1x16x16xbf16> to vector<16x16xbf16>
    %128 = arith.extf %127 : vector<16x16xbf16> to vector<16x16xf32>
    %129 = vector.shape_cast %2 : vector<128xf32> to vector<1x128xf32>
    %130 = vector.broadcast %124 : vector<16x1xf32> to vector<16x128xf32>
    %131 = vector.broadcast %129 : vector<1x128xf32> to vector<16x128xf32>
    %132 = arith.mulf %130, %131 : vector<16x128xf32>
    %133 = vector.shape_cast %4 : vector<128xf32> to vector<1x128xf32>
    %134 = vector.broadcast %133 : vector<1x128xf32> to vector<16x128xf32>
    %135 = arith.addf %132, %134 : vector<16x128xf32>
    %cst_24 = arith.constant dense<0.000000e+00> : vector<16x128xf32>
    %136 = tpu.matmul %128, %135, %cst_24 {dimension_numbers = #tpu.dot_dimension_numbers<[1], [0], [0], [1], [0, 0, 1, 1], [], []>} : vector<16x16xf32>, vector<16x128xf32>, vector<16x128xf32> -> vector<16x128xf32>
    %137 = vector.shape_cast %6 : vector<128xf32> to vector<1x128xf32>
    %138 = vector.broadcast %124 : vector<16x1xf32> to vector<16x128xf32>
    %139 = vector.broadcast %137 : vector<1x128xf32> to vector<16x128xf32>
    %140 = arith.mulf %138, %139 : vector<16x128xf32>
    %141 = vector.shape_cast %8 : vector<128xf32> to vector<1x128xf32>
    %142 = vector.broadcast %141 : vector<1x128xf32> to vector<16x128xf32>
    %143 = arith.addf %140, %142 : vector<16x128xf32>
    %144 = arith.negf %143 : vector<16x128xf32>
    %145 = math.exp %144 : vector<16x128xf32>
    %cst_25 = arith.constant 1.000000e+00 : f32
    %146 = vector.broadcast %cst_25 : f32 to vector<16x128xf32>
    %147 = arith.addf %146, %145 : vector<16x128xf32>
    %148 = arith.divf %146, %147 : vector<16x128xf32>
    %149 = arith.mulf %136, %148 : vector<16x128xf32>
    %cst_26 = arith.constant 0.000000e+00 : f32
    %150 = vector.broadcast %cst_26 : f32 to vector<16x128xf32>
    %151 = arith.maximumf %149, %150 : vector<16x128xf32>
    %152 = vector.shape_cast %10 : vector<128xf32> to vector<1x128xf32>
    %153 = vector.broadcast %152 : vector<1x128xf32> to vector<16x128xf32>
    %154 = arith.mulf %151, %153 : vector<16x128xf32>
    %155 = vector.shape_cast %12 : vector<128xf32> to vector<1x128xf32>
    %156 = vector.broadcast %155 : vector<1x128xf32> to vector<16x128xf32>
    %157 = arith.addf %154, %156 : vector<16x128xf32>
    %cst_27 = arith.constant dense<0.000000e+00> : vector<16x128xf32>
    %158 = tpu.matmul %128, %157, %cst_27 {dimension_numbers = #tpu.dot_dimension_numbers<[1], [0], [0], [1], [0, 0, 1, 1], [], []>} : vector<16x16xf32>, vector<16x128xf32>, vector<16x128xf32> -> vector<16x128xf32>
    %159 = vector.shape_cast %14 : vector<128xf32> to vector<1x128xf32>
    %160 = vector.broadcast %159 : vector<1x128xf32> to vector<16x128xf32>
    %161 = arith.mulf %151, %160 : vector<16x128xf32>
    %162 = vector.shape_cast %16 : vector<128xf32> to vector<1x128xf32>
    %163 = vector.broadcast %162 : vector<1x128xf32> to vector<16x128xf32>
    %164 = arith.addf %161, %163 : vector<16x128xf32>
    %165 = arith.negf %164 : vector<16x128xf32>
    %166 = math.exp %165 : vector<16x128xf32>
    %cst_28 = arith.constant 1.000000e+00 : f32
    %167 = vector.broadcast %cst_28 : f32 to vector<16x128xf32>
    %168 = arith.addf %167, %166 : vector<16x128xf32>
    %169 = arith.divf %167, %168 : vector<16x128xf32>
    %170 = arith.mulf %158, %169 : vector<16x128xf32>
    %cst_29 = arith.constant 0.000000e+00 : f32
    %171 = vector.broadcast %cst_29 : f32 to vector<16x128xf32>
    %172 = arith.maximumf %170, %171 : vector<16x128xf32>
    %cst_30 = arith.constant dense<0.000000e+00> : vector<128xf32>
    %173 = vector.multi_reduction <add>, %172, %cst_30 [0] : vector<16x128xf32> to vector<128xf32>
    %174 = vector.shape_cast %173 : vector<128xf32> to vector<1x128xf32>
    %175 = vector.broadcast %cst : f32 to vector<1x128xf32>
    %176 = arith.mulf %174, %175 : vector<1x128xf32>
    %177 = vector.shape_cast %18 : vector<128xf32> to vector<1x128xf32>
    %178 = arith.mulf %176, %177 : vector<1x128xf32>
    %cst_31 = arith.constant dense<0.000000e+00> : vector<1xf32>
    %179 = vector.multi_reduction <add>, %178, %cst_31 [1] : vector<1x128xf32> to vector<1xf32>
    %180 = vector.shape_cast %179 : vector<1xf32> to vector<1x1xf32>
    %181 = vector.shape_cast %20 : vector<128xf32> to vector<1x128xf32>
    %182 = vector.broadcast %180 : vector<1x1xf32> to vector<1x128xf32>
    %183 = arith.addf %182, %181 : vector<1x128xf32>
    %184 = vector.shape_cast %6 : vector<128xf32> to vector<1x128xf32>
    %185 = arith.mulf %183, %184 : vector<1x128xf32>
    %186 = vector.shape_cast %8 : vector<128xf32> to vector<1x128xf32>
    %187 = arith.addf %185, %186 : vector<1x128xf32>
    %188 = arith.negf %187 : vector<1x128xf32>
    %189 = math.exp %188 : vector<1x128xf32>
    %cst_32 = arith.constant 1.000000e+00 : f32
    %190 = vector.broadcast %cst_32 : f32 to vector<1x128xf32>
    %191 = arith.addf %190, %189 : vector<1x128xf32>
    %192 = arith.divf %190, %191 : vector<1x128xf32>
    %193 = vector.shape_cast %14 : vector<128xf32> to vector<1x128xf32>
    %194 = arith.mulf %183, %193 : vector<1x128xf32>
    %195 = vector.shape_cast %16 : vector<128xf32> to vector<1x128xf32>
    %196 = arith.addf %194, %195 : vector<1x128xf32>
    %197 = arith.negf %196 : vector<1x128xf32>
    %198 = math.exp %197 : vector<1x128xf32>
    %cst_33 = arith.constant 1.000000e+00 : f32
    %199 = vector.broadcast %cst_33 : f32 to vector<1x128xf32>
    %200 = arith.addf %199, %198 : vector<1x128xf32>
    %201 = arith.divf %199, %200 : vector<1x128xf32>
    %c0_i32_34 = arith.constant 0 : i32
    %202 = vector.broadcast %c0_i32_34 : i32 to vector<8x128xi32>
    %203 = arith.cmpi eq, %21, %202 : vector<8x128xi32>
    %c1_i32_35 = arith.constant 1 : i32
    %204 = vector.broadcast %c1_i32_35 : i32 to vector<8x128xi32>
    %205 = arith.cmpi eq, %21, %204 : vector<8x128xi32>
    %c2_i32_36 = arith.constant 2 : i32
    %206 = vector.broadcast %c2_i32_36 : i32 to vector<8x128xi32>
    %207 = arith.cmpi eq, %21, %206 : vector<8x128xi32>
    %cst_37 = arith.constant 0.000000e+00 : f32
    %208 = vector.shape_cast %201 : vector<1x128xf32> to vector<1x128xf32>
    %209 = vector.broadcast %208 : vector<1x128xf32> to vector<8x128xf32>
    %210 = vector.broadcast %cst_37 : f32 to vector<8x128xf32>
    %211 = arith.select %207, %209, %210 : vector<8x128xi1>, vector<8x128xf32>
    %212 = vector.shape_cast %192 : vector<1x128xf32> to vector<1x128xf32>
    %213 = vector.broadcast %212 : vector<1x128xf32> to vector<8x128xf32>
    %214 = arith.select %205, %213, %211 : vector<8x128xi1>, vector<8x128xf32>
    %215 = vector.shape_cast %183 : vector<1x128xf32> to vector<1x128xf32>
    %216 = vector.broadcast %215 : vector<1x128xf32> to vector<8x128xf32>
    %217 = arith.select %203, %216, %214 : vector<8x128xi1>, vector<8x128xf32>
    %218 = arith.index_cast %c1_i32_19 : i32 to index
    %c0_38 = arith.constant 0 : index
    %c0_39 = arith.constant 0 : index
    %219 = vector.load %arg4[%218, %c0_38, %c0_39] : memref<4x8x128xf32, #tpu.memory_space<vmem>>, vector<1x8x128xf32>
    %220 = vector.shape_cast %219 : vector<1x8x128xf32> to vector<8x128xf32>
    %221 = vector.shape_cast %217 : vector<8x128xf32> to vector<1x8x128xf32>
    tpu.vector_store %arg4[%218, %c0_38, %c0_39], %221 {strides = array<i32>} : memref<4x8x128xf32, #tpu.memory_space<vmem>>, vector<1x8x128xf32>,
    %c2_i32_40 = arith.constant 2 : i32
    %222 = arith.index_cast %c2_i32_40 : i32 to index
    %c0_41 = arith.constant 0 : index
    %c0_42 = arith.constant 0 : index
    %223 = vector.load %arg1[%222, %c0_41, %c0_42] : memref<4x16x1xf32, #tpu.memory_space<vmem>>, vector<1x16x1xf32>
    %224 = vector.shape_cast %223 : vector<1x16x1xf32> to vector<16x1xf32>
    %225 = arith.index_cast %c2_i32_40 : i32 to index
    %c0_43 = arith.constant 0 : index
    %c0_44 = arith.constant 0 : index
    %226 = vector.load %arg2[%225, %c0_43, %c0_44] : memref<4x16x16xbf16, #tpu.memory_space<vmem>>, vector<1x16x16xbf16>
    %227 = vector.shape_cast %226 : vector<1x16x16xbf16> to vector<16x16xbf16>
    %228 = arith.extf %227 : vector<16x16xbf16> to vector<16x16xf32>
    %229 = vector.shape_cast %2 : vector<128xf32> to vector<1x128xf32>
    %230 = vector.broadcast %224 : vector<16x1xf32> to vector<16x128xf32>
    %231 = vector.broadcast %229 : vector<1x128xf32> to vector<16x128xf32>
    %232 = arith.mulf %230, %231 : vector<16x128xf32>
    %233 = vector.shape_cast %4 : vector<128xf32> to vector<1x128xf32>
    %234 = vector.broadcast %233 : vector<1x128xf32> to vector<16x128xf32>
    %235 = arith.addf %232, %234 : vector<16x128xf32>
    %cst_45 = arith.constant dense<0.000000e+00> : vector<16x128xf32>
    %236 = tpu.matmul %228, %235, %cst_45 {dimension_numbers = #tpu.dot_dimension_numbers<[1], [0], [0], [1], [0, 0, 1, 1], [], []>} : vector<16x16xf32>, vector<16x128xf32>, vector<16x128xf32> -> vector<16x128xf32>
    %237 = vector.shape_cast %6 : vector<128xf32> to vector<1x128xf32>
    %238 = vector.broadcast %224 : vector<16x1xf32> to vector<16x128xf32>
    %239 = vector.broadcast %237 : vector<1x128xf32> to vector<16x128xf32>
    %240 = arith.mulf %238, %239 : vector<16x128xf32>
    %241 = vector.shape_cast %8 : vector<128xf32> to vector<1x128xf32>
    %242 = vector.broadcast %241 : vector<1x128xf32> to vector<16x128xf32>
    %243 = arith.addf %240, %242 : vector<16x128xf32>
    %244 = arith.negf %243 : vector<16x128xf32>
    %245 = math.exp %244 : vector<16x128xf32>
    %cst_46 = arith.constant 1.000000e+00 : f32
    %246 = vector.broadcast %cst_46 : f32 to vector<16x128xf32>
    %247 = arith.addf %246, %245 : vector<16x128xf32>
    %248 = arith.divf %246, %247 : vector<16x128xf32>
    %249 = arith.mulf %236, %248 : vector<16x128xf32>
    %cst_47 = arith.constant 0.000000e+00 : f32
    %250 = vector.broadcast %cst_47 : f32 to vector<16x128xf32>
    %251 = arith.maximumf %249, %250 : vector<16x128xf32>
    %252 = vector.shape_cast %10 : vector<128xf32> to vector<1x128xf32>
    %253 = vector.broadcast %252 : vector<1x128xf32> to vector<16x128xf32>
    %254 = arith.mulf %251, %253 : vector<16x128xf32>
    %255 = vector.shape_cast %12 : vector<128xf32> to vector<1x128xf32>
    %256 = vector.broadcast %255 : vector<1x128xf32> to vector<16x128xf32>
    %257 = arith.addf %254, %256 : vector<16x128xf32>
    %cst_48 = arith.constant dense<0.000000e+00> : vector<16x128xf32>
    %258 = tpu.matmul %228, %257, %cst_48 {dimension_numbers = #tpu.dot_dimension_numbers<[1], [0], [0], [1], [0, 0, 1, 1], [], []>} : vector<16x16xf32>, vector<16x128xf32>, vector<16x128xf32> -> vector<16x128xf32>
    %259 = vector.shape_cast %14 : vector<128xf32> to vector<1x128xf32>
    %260 = vector.broadcast %259 : vector<1x128xf32> to vector<16x128xf32>
    %261 = arith.mulf %251, %260 : vector<16x128xf32>
    %262 = vector.shape_cast %16 : vector<128xf32> to vector<1x128xf32>
    %263 = vector.broadcast %262 : vector<1x128xf32> to vector<16x128xf32>
    %264 = arith.addf %261, %263 : vector<16x128xf32>
    %265 = arith.negf %264 : vector<16x128xf32>
    %266 = math.exp %265 : vector<16x128xf32>
    %cst_49 = arith.constant 1.000000e+00 : f32
    %267 = vector.broadcast %cst_49 : f32 to vector<16x128xf32>
    %268 = arith.addf %267, %266 : vector<16x128xf32>
    %269 = arith.divf %267, %268 : vector<16x128xf32>
    %270 = arith.mulf %258, %269 : vector<16x128xf32>
    %cst_50 = arith.constant 0.000000e+00 : f32
    %271 = vector.broadcast %cst_50 : f32 to vector<16x128xf32>
    %272 = arith.maximumf %270, %271 : vector<16x128xf32>
    %cst_51 = arith.constant dense<0.000000e+00> : vector<128xf32>
    %273 = vector.multi_reduction <add>, %272, %cst_51 [0] : vector<16x128xf32> to vector<128xf32>
    %274 = vector.shape_cast %273 : vector<128xf32> to vector<1x128xf32>
    %275 = vector.broadcast %cst : f32 to vector<1x128xf32>
    %276 = arith.mulf %274, %275 : vector<1x128xf32>
    %277 = vector.shape_cast %18 : vector<128xf32> to vector<1x128xf32>
    %278 = arith.mulf %276, %277 : vector<1x128xf32>
    %cst_52 = arith.constant dense<0.000000e+00> : vector<1xf32>
    %279 = vector.multi_reduction <add>, %278, %cst_52 [1] : vector<1x128xf32> to vector<1xf32>
    %280 = vector.shape_cast %279 : vector<1xf32> to vector<1x1xf32>
    %281 = vector.shape_cast %20 : vector<128xf32> to vector<1x128xf32>
    %282 = vector.broadcast %280 : vector<1x1xf32> to vector<1x128xf32>
    %283 = arith.addf %282, %281 : vector<1x128xf32>
    %284 = vector.shape_cast %6 : vector<128xf32> to vector<1x128xf32>
    %285 = arith.mulf %283, %284 : vector<1x128xf32>
    %286 = vector.shape_cast %8 : vector<128xf32> to vector<1x128xf32>
    %287 = arith.addf %285, %286 : vector<1x128xf32>
    %288 = arith.negf %287 : vector<1x128xf32>
    %289 = math.exp %288 : vector<1x128xf32>
    %cst_53 = arith.constant 1.000000e+00 : f32
    %290 = vector.broadcast %cst_53 : f32 to vector<1x128xf32>
    %291 = arith.addf %290, %289 : vector<1x128xf32>
    %292 = arith.divf %290, %291 : vector<1x128xf32>
    %293 = vector.shape_cast %14 : vector<128xf32> to vector<1x128xf32>
    %294 = arith.mulf %283, %293 : vector<1x128xf32>
    %295 = vector.shape_cast %16 : vector<128xf32> to vector<1x128xf32>
    %296 = arith.addf %294, %295 : vector<1x128xf32>
    %297 = arith.negf %296 : vector<1x128xf32>
    %298 = math.exp %297 : vector<1x128xf32>
    %cst_54 = arith.constant 1.000000e+00 : f32
    %299 = vector.broadcast %cst_54 : f32 to vector<1x128xf32>
    %300 = arith.addf %299, %298 : vector<1x128xf32>
    %301 = arith.divf %299, %300 : vector<1x128xf32>
    %c0_i32_55 = arith.constant 0 : i32
    %302 = vector.broadcast %c0_i32_55 : i32 to vector<8x128xi32>
    %303 = arith.cmpi eq, %21, %302 : vector<8x128xi32>
    %c1_i32_56 = arith.constant 1 : i32
    %304 = vector.broadcast %c1_i32_56 : i32 to vector<8x128xi32>
    %305 = arith.cmpi eq, %21, %304 : vector<8x128xi32>
    %c2_i32_57 = arith.constant 2 : i32
    %306 = vector.broadcast %c2_i32_57 : i32 to vector<8x128xi32>
    %307 = arith.cmpi eq, %21, %306 : vector<8x128xi32>
    %cst_58 = arith.constant 0.000000e+00 : f32
    %308 = vector.shape_cast %301 : vector<1x128xf32> to vector<1x128xf32>
    %309 = vector.broadcast %308 : vector<1x128xf32> to vector<8x128xf32>
    %310 = vector.broadcast %cst_58 : f32 to vector<8x128xf32>
    %311 = arith.select %307, %309, %310 : vector<8x128xi1>, vector<8x128xf32>
    %312 = vector.shape_cast %292 : vector<1x128xf32> to vector<1x128xf32>
    %313 = vector.broadcast %312 : vector<1x128xf32> to vector<8x128xf32>
    %314 = arith.select %305, %313, %311 : vector<8x128xi1>, vector<8x128xf32>
    %315 = vector.shape_cast %283 : vector<1x128xf32> to vector<1x128xf32>
    %316 = vector.broadcast %315 : vector<1x128xf32> to vector<8x128xf32>
    %317 = arith.select %303, %316, %314 : vector<8x128xi1>, vector<8x128xf32>
    %318 = arith.index_cast %c2_i32_40 : i32 to index
    %c0_59 = arith.constant 0 : index
    %c0_60 = arith.constant 0 : index
    %319 = vector.load %arg4[%318, %c0_59, %c0_60] : memref<4x8x128xf32, #tpu.memory_space<vmem>>, vector<1x8x128xf32>
    %320 = vector.shape_cast %319 : vector<1x8x128xf32> to vector<8x128xf32>
    %321 = vector.shape_cast %317 : vector<8x128xf32> to vector<1x8x128xf32>
    tpu.vector_store %arg4[%318, %c0_59, %c0_60], %321 {strides = array<i32>} : memref<4x8x128xf32, #tpu.memory_space<vmem>>, vector<1x8x128xf32>,
    %c3_i32 = arith.constant 3 : i32
    %322 = arith.index_cast %c3_i32 : i32 to index
    %c0_61 = arith.constant 0 : index
    %c0_62 = arith.constant 0 : index
    %323 = vector.load %arg1[%322, %c0_61, %c0_62] : memref<4x16x1xf32, #tpu.memory_space<vmem>>, vector<1x16x1xf32>
    %324 = vector.shape_cast %323 : vector<1x16x1xf32> to vector<16x1xf32>
    %325 = arith.index_cast %c3_i32 : i32 to index
    %c0_63 = arith.constant 0 : index
    %c0_64 = arith.constant 0 : index
    %326 = vector.load %arg2[%325, %c0_63, %c0_64] : memref<4x16x16xbf16, #tpu.memory_space<vmem>>, vector<1x16x16xbf16>
    %327 = vector.shape_cast %326 : vector<1x16x16xbf16> to vector<16x16xbf16>
    %328 = arith.extf %327 : vector<16x16xbf16> to vector<16x16xf32>
    %329 = vector.shape_cast %2 : vector<128xf32> to vector<1x128xf32>
    %330 = vector.broadcast %324 : vector<16x1xf32> to vector<16x128xf32>
    %331 = vector.broadcast %329 : vector<1x128xf32> to vector<16x128xf32>
    %332 = arith.mulf %330, %331 : vector<16x128xf32>
    %333 = vector.shape_cast %4 : vector<128xf32> to vector<1x128xf32>
    %334 = vector.broadcast %333 : vector<1x128xf32> to vector<16x128xf32>
    %335 = arith.addf %332, %334 : vector<16x128xf32>
    %cst_65 = arith.constant dense<0.000000e+00> : vector<16x128xf32>
    %336 = tpu.matmul %328, %335, %cst_65 {dimension_numbers = #tpu.dot_dimension_numbers<[1], [0], [0], [1], [0, 0, 1, 1], [], []>} : vector<16x16xf32>, vector<16x128xf32>, vector<16x128xf32> -> vector<16x128xf32>
    %337 = vector.shape_cast %6 : vector<128xf32> to vector<1x128xf32>
    %338 = vector.broadcast %324 : vector<16x1xf32> to vector<16x128xf32>
    %339 = vector.broadcast %337 : vector<1x128xf32> to vector<16x128xf32>
    %340 = arith.mulf %338, %339 : vector<16x128xf32>
    %341 = vector.shape_cast %8 : vector<128xf32> to vector<1x128xf32>
    %342 = vector.broadcast %341 : vector<1x128xf32> to vector<16x128xf32>
    %343 = arith.addf %340, %342 : vector<16x128xf32>
    %344 = arith.negf %343 : vector<16x128xf32>
    %345 = math.exp %344 : vector<16x128xf32>
    %cst_66 = arith.constant 1.000000e+00 : f32
    %346 = vector.broadcast %cst_66 : f32 to vector<16x128xf32>
    %347 = arith.addf %346, %345 : vector<16x128xf32>
    %348 = arith.divf %346, %347 : vector<16x128xf32>
    %349 = arith.mulf %336, %348 : vector<16x128xf32>
    %cst_67 = arith.constant 0.000000e+00 : f32
    %350 = vector.broadcast %cst_67 : f32 to vector<16x128xf32>
    %351 = arith.maximumf %349, %350 : vector<16x128xf32>
    %352 = vector.shape_cast %10 : vector<128xf32> to vector<1x128xf32>
    %353 = vector.broadcast %352 : vector<1x128xf32> to vector<16x128xf32>
    %354 = arith.mulf %351, %353 : vector<16x128xf32>
    %355 = vector.shape_cast %12 : vector<128xf32> to vector<1x128xf32>
    %356 = vector.broadcast %355 : vector<1x128xf32> to vector<16x128xf32>
    %357 = arith.addf %354, %356 : vector<16x128xf32>
    %cst_68 = arith.constant dense<0.000000e+00> : vector<16x128xf32>
    %358 = tpu.matmul %328, %357, %cst_68 {dimension_numbers = #tpu.dot_dimension_numbers<[1], [0], [0], [1], [0, 0, 1, 1], [], []>} : vector<16x16xf32>, vector<16x128xf32>, vector<16x128xf32> -> vector<16x128xf32>
    %359 = vector.shape_cast %14 : vector<128xf32> to vector<1x128xf32>
    %360 = vector.broadcast %359 : vector<1x128xf32> to vector<16x128xf32>
    %361 = arith.mulf %351, %360 : vector<16x128xf32>
    %362 = vector.shape_cast %16 : vector<128xf32> to vector<1x128xf32>
    %363 = vector.broadcast %362 : vector<1x128xf32> to vector<16x128xf32>
    %364 = arith.addf %361, %363 : vector<16x128xf32>
    %365 = arith.negf %364 : vector<16x128xf32>
    %366 = math.exp %365 : vector<16x128xf32>
    %cst_69 = arith.constant 1.000000e+00 : f32
    %367 = vector.broadcast %cst_69 : f32 to vector<16x128xf32>
    %368 = arith.addf %367, %366 : vector<16x128xf32>
    %369 = arith.divf %367, %368 : vector<16x128xf32>
    %370 = arith.mulf %358, %369 : vector<16x128xf32>
    %cst_70 = arith.constant 0.000000e+00 : f32
    %371 = vector.broadcast %cst_70 : f32 to vector<16x128xf32>
    %372 = arith.maximumf %370, %371 : vector<16x128xf32>
    %cst_71 = arith.constant dense<0.000000e+00> : vector<128xf32>
    %373 = vector.multi_reduction <add>, %372, %cst_71 [0] : vector<16x128xf32> to vector<128xf32>
    %374 = vector.shape_cast %373 : vector<128xf32> to vector<1x128xf32>
    %375 = vector.broadcast %cst : f32 to vector<1x128xf32>
    %376 = arith.mulf %374, %375 : vector<1x128xf32>
    %377 = vector.shape_cast %18 : vector<128xf32> to vector<1x128xf32>
    %378 = arith.mulf %376, %377 : vector<1x128xf32>
    %cst_72 = arith.constant dense<0.000000e+00> : vector<1xf32>
    %379 = vector.multi_reduction <add>, %378, %cst_72 [1] : vector<1x128xf32> to vector<1xf32>
    %380 = vector.shape_cast %379 : vector<1xf32> to vector<1x1xf32>
    %381 = vector.shape_cast %20 : vector<128xf32> to vector<1x128xf32>
    %382 = vector.broadcast %380 : vector<1x1xf32> to vector<1x128xf32>
    %383 = arith.addf %382, %381 : vector<1x128xf32>
    %384 = vector.shape_cast %6 : vector<128xf32> to vector<1x128xf32>
    %385 = arith.mulf %383, %384 : vector<1x128xf32>
    %386 = vector.shape_cast %8 : vector<128xf32> to vector<1x128xf32>
    %387 = arith.addf %385, %386 : vector<1x128xf32>
    %388 = arith.negf %387 : vector<1x128xf32>
    %389 = math.exp %388 : vector<1x128xf32>
    %cst_73 = arith.constant 1.000000e+00 : f32
    %390 = vector.broadcast %cst_73 : f32 to vector<1x128xf32>
    %391 = arith.addf %390, %389 : vector<1x128xf32>
    %392 = arith.divf %390, %391 : vector<1x128xf32>
    %393 = vector.shape_cast %14 : vector<128xf32> to vector<1x128xf32>
    %394 = arith.mulf %383, %393 : vector<1x128xf32>
    %395 = vector.shape_cast %16 : vector<128xf32> to vector<1x128xf32>
    %396 = arith.addf %394, %395 : vector<1x128xf32>
    %397 = arith.negf %396 : vector<1x128xf32>
    %398 = math.exp %397 : vector<1x128xf32>
    %cst_74 = arith.constant 1.000000e+00 : f32
    %399 = vector.broadcast %cst_74 : f32 to vector<1x128xf32>
    %400 = arith.addf %399, %398 : vector<1x128xf32>
    %401 = arith.divf %399, %400 : vector<1x128xf32>
    %c0_i32_75 = arith.constant 0 : i32
    %402 = vector.broadcast %c0_i32_75 : i32 to vector<8x128xi32>
    %403 = arith.cmpi eq, %21, %402 : vector<8x128xi32>
    %c1_i32_76 = arith.constant 1 : i32
    %404 = vector.broadcast %c1_i32_76 : i32 to vector<8x128xi32>
    %405 = arith.cmpi eq, %21, %404 : vector<8x128xi32>
    %c2_i32_77 = arith.constant 2 : i32
    %406 = vector.broadcast %c2_i32_77 : i32 to vector<8x128xi32>
    %407 = arith.cmpi eq, %21, %406 : vector<8x128xi32>
    %cst_78 = arith.constant 0.000000e+00 : f32
    %408 = vector.shape_cast %401 : vector<1x128xf32> to vector<1x128xf32>
    %409 = vector.broadcast %408 : vector<1x128xf32> to vector<8x128xf32>
    %410 = vector.broadcast %cst_78 : f32 to vector<8x128xf32>
    %411 = arith.select %407, %409, %410 : vector<8x128xi1>, vector<8x128xf32>
    %412 = vector.shape_cast %392 : vector<1x128xf32> to vector<1x128xf32>
    %413 = vector.broadcast %412 : vector<1x128xf32> to vector<8x128xf32>
    %414 = arith.select %405, %413, %411 : vector<8x128xi1>, vector<8x128xf32>
    %415 = vector.shape_cast %383 : vector<1x128xf32> to vector<1x128xf32>
    %416 = vector.broadcast %415 : vector<1x128xf32> to vector<8x128xf32>
    %417 = arith.select %403, %416, %414 : vector<8x128xi1>, vector<8x128xf32>
    %418 = arith.index_cast %c3_i32 : i32 to index
    %c0_79 = arith.constant 0 : index
    %c0_80 = arith.constant 0 : index
    %419 = vector.load %arg4[%418, %c0_79, %c0_80] : memref<4x8x128xf32, #tpu.memory_space<vmem>>, vector<1x8x128xf32>
    %420 = vector.shape_cast %419 : vector<1x8x128xf32> to vector<8x128xf32>
    %421 = vector.shape_cast %417 : vector<8x128xf32> to vector<1x8x128xf32>
    tpu.vector_store %arg4[%418, %c0_79, %c0_80], %421 {strides = array<i32>} : memref<4x8x128xf32, #tpu.memory_space<vmem>>, vector<1x8x128xf32>,
    %c4_i32 = arith.constant 4 : i32
    return
  }
  func.func @transform_0(%arg0: i32) -> (i32, i32, i32) {
    %c0_i32 = arith.constant 0 : i32
    %c0_i32_0 = arith.constant 0 : i32
    %c0_i32_1 = arith.constant 0 : i32
    return %arg0, %c0_i32, %c0_i32_0 : i32, i32, i32
  }
  func.func @transform_1(%arg0: i32) -> (i32, i32, i32) {
    %c0_i32 = arith.constant 0 : i32
    %c0_i32_0 = arith.constant 0 : i32
    %c0_i32_1 = arith.constant 0 : i32
    return %arg0, %c0_i32, %c0_i32_0 : i32, i32, i32
  }
  func.func @transform_2(%arg0: i32) -> (i32, i32) {
    %c0_i32 = arith.constant 0 : i32
    %c0_i32_0 = arith.constant 0 : i32
    %c0_i32_1 = arith.constant 0 : i32
    return %c0_i32, %c0_i32_0 : i32, i32
  }
  func.func @transform_3(%arg0: i32) -> (i32, i32, i32) {
    %c0_i32 = arith.constant 0 : i32
    %c0_i32_0 = arith.constant 0 : i32
    %c0_i32_1 = arith.constant 0 : i32
    return %arg0, %c0_i32, %c0_i32_0 : i32, i32, i32
  }
}

</mosaic_0001>

<bundles_post_ra>
// kernel: tpu_custom_call.1
= control target key start
LH: loop header
LB: loop body
LE: loop exit
PB: predicated region body
PF: predicated region fallthrough
CT: control target
= control target key end

     0   :  { %8 = vsyncpa [#allocation3], 0  ;;  %s2115_s0 = inlined_call_operand.vmem [shape: f32[8,16,1], index: 0, kind: input, shape index: {}]   ;;  %s2116_s1 = inlined_call_operand.vmem [shape: bf16[8,16,16], index: 1, kind: input, shape index: {}]   ;;  %s2117_s2 = inlined_call_operand.vmem [shape: f32[16,128], index: 2, kind: input, shape index: {}]   ;;  %s2118_s3 = inlined_call_operand.hbm [shape: f32[8,8,128], index: 3, kind: output, shape index: {}]  }
   0x1   :  { %10 = vsyncpa [#allocation3 + $0x1], 0  ;;  %s1817_s12 = smov 0   ;;  %s1819_s13 = smov 0  }
   0x2   :  { %s1821_s14 = smov 0   ;;  %s1823_s15 = smov 0  }
   0x3 LB: > { %s1838_s16 = sadd.s32 4294967295, %s1791_s15   ;;  %s1410_s17 = sadd.s32 4294967294, %s1791_s15   ;;  %s1791_s15 = sphi %s1823_s15, %s2124_s15   ;;  %s1787_s14 = sphi %s1821_s14, %s2123_s14   ;;  %s1783_s13 = sphi %s1819_s13, %s2122_s13   ;;  %s1779_s12 = sphi %s1817_s12, %s2121_s12  }
   0x4   : > { %s1842_s18 = sadd.s32 1, %s1791_s15   ;;  %s96_s19 = sadd.s32 1, %s1787_s14 }
   0x5   : > { %s93_s20 = ssub.s32 %s1791_s15, %s1842_s18  ;;  %p106_p0 = scmp.ne.s32.totalorder %s1787_s14, %s1783_s13 }
   0x6   : > { %p94_p1 = scmp.eq.s32.totalorder %s93_s20, 0  ;;  %p107_p2 = scmp.eq.s32.totalorder %s1838_s16, 1 }
   0x7   : > { %p112_p3 = scmp.ne.s32.totalorder %s1783_s13, %s1779_s12  ;;  %p113_p4 = scmp.eq.s32.totalorder %s1410_s17, 1 }
   0x8   : > { %s1853_s21 = scalar_select %p94_p1, %s1787_s14, %s96_s19  }
   0x9   : > { %p1855_p5 = por %p107_p2, %p106_p0  ;;  %p1859_p6 = por %p113_p4, %p112_p3 }
   0xa   : > { %p1413_p7 = scmp.ge.s32.totalorder %s1791_s15, 1  ;;  %p154_p8 = scmp.lt.s32.totalorder %s1791_s15, 3 }
   0xc   : > { %p155_p9 = pnand %p1413_p7, %p154_p8 }
   0xd   : > { %s1415_s24 = sshll.u32 (!%p155_p9), %s1838_s16, 2  ;;  %s182_s10 = sand.u32 (!%p155_p9), 1, %s1783_s13  }
   0xe   : > { %158 = sbr.rel (%p155_p9) target bundleno = 788 (0x314), region = 32  ;;  %p186_p10 = scmp.lt.s32.totalorder (!%p155_p9), %s1415_s24, 7 }
   0xf   : > { %s1414_s11 = sshll.u32 (!%p155_p9), %s182_s10, 5  ;;  %s1483_s19 = sshll.u32 (!%p155_p9), %s1838_s16, 9 }
  0x10   : > { %s184_s17 = scalar_lea.vmem (!%p155_p9), [#allocation2], %s1414_s11  ;;  %s2065_s26 = scalar_lea.hbm (!%p155_p9), %s2118_s3, %s1483_s19 }
  0x11   : > { %s1336_s20 = sshll.u32 (!%p155_p9), %s184_s17, 4  ;;  %s2075_s16 = scalar_lea.sflag (!%p155_p9), [#allocation3], %s182_s10  ;;  %s2067_s20 = int_to_ptr.vmem [resolvable:$true] %s1336_s20 }
  0x12   : > { %s1731_s27 = scalar_lea.vmem (!%p155_p9), %s2067_s20, 512 }
  0x13   : > { %v1793_v0 = vmov 0   ;;  %s2126_s24 = smov (!%p186_p10, %s1415_s24), 7  ;;  %vm232_vm0 = vcmask 130048   ;;  %v202_v11 = vlaneseq  ;;  %v1888_v14 = vld [vmem:[%s2117_s2] sm:$0xff]  ;;  %vm466_vm1 = vcmask 1040384   ;;  %p1732_p11 = scmp.ne.s32.totalorder %s2067_s20, %s1731_s27 }
  0x14   : > { %1634 = vset.pattern.permute.xlu1 %v1793_v0  ;;  %1633 = vset.pattern.permute.xlu0 %v1793_v0  ;;  %s1481_s25 = sshll.u32 %s2126_s24, 4  ;;  %s1482_s29 = sshll.u32 %s2126_s24, 3 }
  0x15   : > { %s190_s28 = scalar_lea.vmem %s2115_s0, %s1481_s25  ;;  %s1872_s5 = scalar_lea.vmem %s2116_s1, %s1482_s29  ;;  %v1880_v12 = vshrl.u32 %v202_v11, 7 }
  0x16   : > { %v1432_v1 = vld [vmem:[%s190_s28 + $0x18] sm:$0xff]  ;;  %v205_v2 = vld [vmem:[%s190_s28 + $0x8] sm:$0xff]  ;;  %v1431_v3 = vld [vmem:[%s190_s28 + $0x10] sm:$0xff]  ;;  %p1733_p12 = pnand %p1732_p11, %p1855_p5 }
  0x17   : > { %533 = vperm.xlu1 %1634, %v1432_v1   ;;  %217 = vperm.xlu0 %1633, %v205_v2   ;;  %v204_v4 = vld [vmem:[%s190_s28] sm:$0xff]  ;;  %v1447_v8 = vld [vmem:[%s190_s28 + $0x28] sm:$0xff]  ;;  %v1461_v9 = vld [vmem:[%s190_s28 + $0x30] sm:$0xff]  ;;  %v1883_v13 = vsub.s32 0, %v1880_v12  ;;  %v228_v15 = vsub.s32 1, %v1880_v12  ;;  %v316_v52 = vsub.s32 2, %v1880_v12 }
  0x18   : > { %v1875_v5 = vld [vmem:[%s1872_s5] sm:$0xff]   ;;  %v1462_v10 = vld [vmem:[%s190_s28 + $0x38] sm:$0xff]  ;;  %v1898_v26 = vld [vmem:[%s1872_s5 + $0x8] sm:$0xff]   ;;  %v322_v54 = vsub.s32 3, %v1880_v12  ;;  %vm501_vm2 = vcmp.eq.s32.totalorder %v1880_v12, 2  ;;  %vm500_vm3 = vcmp.eq.s32.totalorder %v1880_v12, 1  ;;  %p1734_p13 = pneg %p1733_p12 }
  0x19   : > { %v1486_v6 = vunpack.c.l.bf16 %v1875_v5  ;;  %v1446_v7 = vld [vmem:[%s190_s28 + $0x20] sm:$0xff]  ;;  %v223_v16 = vrot.slane %v1888_v14, %v1883_v13  ;;  %v229_v17 = vrot.slane %v1888_v14, %v228_v15  ;;  %v1487_v31 = vunpack.c.h.bf16 %v1875_v5  ;;  %v1903_v35 = vld [vmem:[%s1872_s5 + $0x10] sm:$0xff]   ;;  %v1914_v44 = vld [vmem:[%s1872_s5 + $0x18] sm:$0xff]   ;;  %s1794_s28 = smov [#allocation2]  }
  0x1a   : > { %v1490_v32 = vunpack.c.l.bf16 %v1898_v26  ;;  %v1491_v39 = vunpack.c.h.bf16 %v1898_v26  ;;  %v1494_v41 = vunpack.c.l.bf16 %v1903_v35  ;;  %v1495_v47 = vunpack.c.h.bf16 %v1903_v35  ;;  %s1735_s29 = sshll.u32 %s1794_s28, 4  ;;  %s1736_s29 = int_to_ptr.vmem [resolvable:$false] %s1735_s29 }
  0x1b   : > { %528 = vperm.xlu1 %1634, %v1431_v3   ;;  %212 = vperm.xlu0 %1633, %v204_v4   ;;  %v1498_v48 = vunpack.c.l.bf16 %v1914_v44  ;;  %v1499_v51 = vunpack.c.h.bf16 %v1914_v44  ;;  %v317_v53 = vrot.slane %v1888_v14, %v316_v52  ;;  %v323_v55 = vrot.slane %v1888_v14, %v322_v54  ;;  %s1737_s30 = scalar_lea.vmem %s1736_s29, 1024  ;;  %p1738_p0 = scmp.lt.s32.totalorder %s2067_s20, %s1736_s29 }
  0x1c   : > { %1539 = vmatprep.mubr.msk.f32.mxu0 %vm232_vm0, %v1486_v6  ;;  %1546 = vmatprep.mubr.msk.f32.mxu1 %vm232_vm0, %v1486_v6  ;;  %v431_v26 = vsub.s32 6, %v1880_v12  ;;  %v437_v35 = vsub.s32 7, %v1880_v12  ;;  %vm499_vm4 = vcmp.eq.s32.totalorder %v1880_v12, 0  ;;  %p1739_p1 = scmp.lt.s32.totalorder %s1737_s30, %s1731_s27 }
  0x1e   : > { %p1740_p2 = por %p1739_p1, %p1738_p0 }
  0x1f   : > { %796 = vperm.xlu1 %1634, %v1446_v7   ;;  %801 = vperm.xlu0 %1633, %v1447_v8  }
  0x20   : > { %p1741_p3 = pnand %p1740_p2, %p1734_p13 }
  0x23   : > { %1064 = vperm.xlu1 %1634, %v1461_v9   ;;  %1069 = vperm.xlu0 %1633, %v1462_v10  }
  0x92   : > { %v1894_v18 = vpop.permute.xlu1 %533  ;;  %v218_v19 = vpop.permute.xlu0 %217 }
  0x93   : > { %v225_v20 = vmul.f32 %v223_v16, %v218_v19  ;;  %v537_v24 = vmul.f32 %v1894_v18, %v223_v16  ;;  %v319_v56 = vmul.f32 %v317_v53, %v218_v19  ;;  %v622_v58 = vmul.f32 %v1894_v18, %v317_v53 }
  0x95   : > { %v231_v21 = vadd.f32 %v229_v17, %v225_v20  ;;  %v539_v33 = vadd.f32 %v537_v24, %v229_v17  ;;  %v325_v59 = vadd.f32 %v323_v55, %v319_v56  ;;  %v624_v62 = vadd.f32 %v622_v58, %v323_v55 }
  0x96   : > { %v529_v22 = vpop.permute.xlu1 %528  ;;  %v213_v23 = vpop.permute.xlu0 %212 }
  0x97   : > { %1535 = vmatprep.subr.mxu0 %v231_v21  ;;  %v224_v25 = vmul.f32 %v223_v16, %v213_v23  ;;  %v536_v27 = vmul.f32 %v529_v22, %v223_v16  ;;  %v318_v57 = vmul.f32 %v317_v53, %v213_v23  ;;  %v621_v61 = vmul.f32 %v529_v22, %v317_v53 }
  0x98   : > { %1536 = vmatpush3.msra.mxu0 %v231_v21  ;;  %v1424_v63 = vmul.f32 -1.442695, %v325_v59  ;;  %v1438_v4 = vmul.f32 -1.442695, %v624_v62 }
  0x99   : > { %v230_v28 = vadd.f32 %v229_v17, %v224_v25  ;;  %v538_v36 = vadd.f32 %v536_v27, %v229_v17  ;;  %v324_v60 = vadd.f32 %v323_v55, %v318_v57  ;;  %v623_v3 = vadd.f32 %v621_v61, %v323_v55 }
  0x9a   : > { %v797_v29 = vpop.permute.xlu1 %796  ;;  %v802_v30 = vpop.permute.xlu0 %801  ;;  %1635 = vpow2.f32 %v1424_v63 }
  0x9b   : > { %v805_v34 = vmul.f32 %v802_v30, %v223_v16  ;;  %1537 = vmatprep.subr.mxu0 %v230_v28  ;;  %v804_v37 = vmul.f32 %v797_v29, %v223_v16  ;;  %v890_v0 = vmul.f32 %v802_v30, %v317_v53  ;;  %v1423_v1 = vmul.f32 -1.442695, %v324_v60 }
  0x9c   : > { %1538 = vmatpush3.msra.mxu0 %v230_v28  ;;  %v889_v2 = vmul.f32 %v797_v29, %v317_v53  ;;  %v1437_v9 = vmul.f32 -1.442695, %v623_v3 }
  0x9d   : > { %1540 = vmatmul.mubr.msk.f32.vlgmr.msra.gmra.mxu0 %vm232_vm0, %v1487_v31  ;;  %1549 = vmatprep.subr.mxu0 %v539_v33  ;;  %v807_v42 = vadd.f32 %v805_v34, %v229_v17  ;;  %v806_v45 = vadd.f32 %v804_v37, %v229_v17  ;;  %v892_v7 = vadd.f32 %v890_v0, %v323_v55  ;;  %1637 = vpow2.f32 %v1423_v1 }
  0x9e   : > { %v1070_v38 = vpop.permute.xlu0 %1069  ;;  %v1065_v40 = vpop.permute.xlu1 %1064  ;;  %1550 = vmatpush3.msra.mxu0 %v539_v33  ;;  %1553 = vmatprep.mubr.msk.f32.mxu0 %vm232_vm0, %v1490_v32  ;;  %v891_v8 = vadd.f32 %v889_v2, %v323_v55  ;;  %1639 = vpow2.f32 %v1438_v4 }
  0x9f   : > { %v1073_v43 = vmul.f32 %v1070_v38, %v223_v16  ;;  %1551 = vmatprep.subr.mxu0 %v538_v36  ;;  %v1072_v46 = vmul.f32 %v1065_v40, %v223_v16  ;;  %v1158_v6 = vmul.f32 %v1070_v38, %v317_v53  ;;  %v1157_v10 = vmul.f32 %v1065_v40, %v317_v53 }
  0xa0   : > { %1552 = vmatpush3.msra.mxu0 %v538_v36  ;;  %v1453_v15 = vmul.f32 -1.442695, %v892_v7  ;;  %v1452_v16 = vmul.f32 -1.442695, %v891_v8  ;;  %1641 = vpow2.f32 %v1437_v9  ;;  %v344_v40 = vsub.s32 4, %v1880_v12 }
  0xa1   : > { %1554 = vmatmul.mubr.msk.f32.vlgmr.msra.gmra.mxu0 %vm232_vm0, %v1491_v39  ;;  %1563 = vmatprep.subr.mxu0 %v807_v42  ;;  %v1075_v49 = vadd.f32 %v1073_v43, %v229_v17  ;;  %v1074_v50 = vadd.f32 %v1072_v46, %v229_v17  ;;  %v1160_v11 = vadd.f32 %v1158_v6, %v323_v55  ;;  %v350_v46 = vsub.s32 5, %v1880_v12 }
  0xa2   : > { %1564 = vmatpush3.msra.mxu0 %v807_v42  ;;  %1567 = vmatprep.mubr.msk.f32.mxu0 %vm232_vm0, %v1494_v41  ;;  %v1159_v17 = vadd.f32 %v1157_v10, %v323_v55  ;;  %1643 = vpow2.f32 %v1453_v15 }
  0xa3   : > { %1565 = vmatprep.subr.mxu0 %v806_v45  ;;  %v1468_v18 = vmul.f32 -1.442695, %v1160_v11  ;;  %1645 = vpow2.f32 %v1452_v16  ;;  %v351_v58 = vrot.slane %v1888_v14, %v350_v46 }
  0xa4   : > { %1566 = vmatpush3.msra.mxu0 %v806_v45  ;;  %v1467_v19 = vmul.f32 -1.442695, %v1159_v17 }
  0xa5   : > { %1568 = vmatmul.mubr.msk.f32.vlgmr.msra.gmra.mxu0 %vm232_vm0, %v1495_v47  ;;  %1577 = vmatprep.subr.mxu0 %v1075_v49  ;;  %1647 = vpow2.f32 %v1468_v18 }
  0xa6   : > { %1578 = vmatpush3.msra.mxu0 %v1075_v49  ;;  %1581 = vmatprep.mubr.msk.f32.mxu0 %vm232_vm0, %v1498_v48  ;;  %1649 = vpow2.f32 %v1467_v19 }
  0xa7   : > { %1579 = vmatprep.subr.mxu0 %v1074_v50  ;;  %v1636_v20 = vpop.eup %1635 }
  0xa8   : > { %1580 = vmatpush3.msra.mxu0 %v1074_v50  ;;  %v333_v22 = vadd.f32 1.0, %v1636_v20  ;;  %v345_v50 = vrot.slane %v1888_v14, %v344_v40 }
  0xa9   : > { %1582 = vmatmul.mubr.msk.f32.vlgmr.msra.gmra.mxu0 %vm232_vm0, %v1499_v51 }
  0xaa   : > { %v1638_v21 = vpop.eup %1637  ;;  %1651 = vrcp.f32 %v333_v22 }
  0xab   : > { %v1640_v23 = vpop.eup %1639  ;;  %v332_v24 = vadd.f32 1.0, %v1638_v21 }
  0xac   : > { %v632_v27 = vadd.f32 1.0, %v1640_v23 }
  0xad   : > { %v1642_v25 = vpop.eup %1641  ;;  %1653 = vrcp.f32 %v332_v24 }
  0xae   : > { %v631_v30 = vadd.f32 1.0, %v1642_v25  ;;  %1655 = vrcp.f32 %v632_v27 }
  0xaf   : > { %v1644_v28 = vpop.eup %1643 }
  0xb0   : > { %v1646_v29 = vpop.eup %1645  ;;  %v900_v34 = vadd.f32 1.0, %v1644_v28  ;;  %1657 = vrcp.f32 %v631_v30 }
  0xb1   : > { %v899_v36 = vadd.f32 1.0, %v1646_v29 }
  0xb2   : > { %v1648_v33 = vpop.eup %1647  ;;  %1659 = vrcp.f32 %v900_v34 }
  0xb3   : > { %v1650_v37 = vpop.eup %1649  ;;  %v1168_v38 = vadd.f32 1.0, %v1648_v33  ;;  %1661 = vrcp.f32 %v899_v36 }
  0xb4   : > { %v1167_v42 = vadd.f32 1.0, %v1650_v37 }
  0xb5   : > { %1663 = vrcp.f32 %v1168_v38 }
  0xb6   : > { %1665 = vrcp.f32 %v1167_v42 }
  0xb7   : > { %v1652_v43 = vpop.eup %1651 }
  0xba   : > { %v1654_v52 = vpop.eup %1653 }
  0xbb   : > { %v1656_v56 = vpop.eup %1655 }
  0xbd   : > { %v1658_v63 = vpop.eup %1657 }
  0xbf   : > { %v1660_v6 = vpop.eup %1659 }
  0xc0   : > { %v1662_v8 = vpop.eup %1661 }
  0xc2   : > { %v1664_v17 = vpop.eup %1663 }
  0xc3   : > { %v1666_v27 = vpop.eup %1665 }
 0x15d   : > { %v1541_v45 = vpop.f32.mrf.mxu0 }
 0x15e   : > { %v1941_v49 = vmul.f32 %v1652_v43, %v1541_v45 }
 0x15f   : > { %v305_v53 = vpop.f32.mrf.mxu0 }
 0x160   : > { %v341_v54 = vmax.f32 %v1941_v49, 0.0  ;;  %v1945_v55 = vmul.f32 %v1654_v52, %v305_v53 }
 0x161   : > { %v1555_v57 = vpop.f32.mrf.mxu0 }
 0x162   : > { %v347_v59 = vmul.f32 %v345_v50, %v341_v54  ;;  %v340_v60 = vmax.f32 %v1945_v55, 0.0  ;;  %v1951_v61 = vmul.f32 %v1656_v56, %v1555_v57 }
 0x163   : > { %v612_v62 = vpop.f32.mrf.mxu0 }
 0x164   : > { %v346_v0 = vmul.f32 %v345_v50, %v340_v60  ;;  %v640_v1 = vmax.f32 %v1951_v61, 0.0  ;;  %v1956_v2 = vmul.f32 %v1658_v63, %v612_v62  ;;  %v353_v4 = vadd.f32 %v351_v58, %v347_v59 }
 0x165   : > { %v1569_v3 = vpop.f32.mrf.mxu0 }
 0x166   : > { %v642_v7 = vmul.f32 %v640_v1, %v345_v50  ;;  %v639_v9 = vmax.f32 %v1956_v2, 0.0  ;;  %v906_v10 = vmul.f32 %v1660_v6, %v1569_v3  ;;  %1542 = vmatprep.subr.mxu1 %v353_v4  ;;  %v352_v15 = vadd.f32 %v351_v58, %v346_v0 }
 0x167   : > { %v880_v11 = vpop.f32.mrf.mxu0  ;;  %1543 = vmatpush3.msra.mxu1 %v353_v4 }
 0x168   : > { %v905_v16 = vmul.f32 %v1662_v8, %v880_v11  ;;  %v641_v18 = vmul.f32 %v639_v9, %v345_v50  ;;  %v908_v19 = vmax.f32 %v906_v10, 0.0  ;;  %1544 = vmatprep.subr.mxu1 %v352_v15  ;;  %v644_v21 = vadd.f32 %v642_v7, %v351_v58 }
 0x169   : > { %v1583_v20 = vpop.f32.mrf.mxu0  ;;  %1545 = vmatpush3.msra.mxu1 %v352_v15 }
 0x16a   : > { %v907_v22 = vmax.f32 %v905_v16, 0.0  ;;  %v1174_v23 = vmul.f32 %v1664_v17, %v1583_v20  ;;  %v910_v24 = vmul.f32 %v908_v19, %v345_v50  ;;  %1547 = vmatmul.mubr.msk.f32.vlgmr.msra.gmra.mxu1 %vm232_vm0, %v1487_v31  ;;  %1556 = vmatprep.subr.mxu1 %v644_v21  ;;  %v643_v33 = vadd.f32 %v641_v18, %v351_v58 }
 0x16b   : > { %v1148_v25 = vpop.f32.mrf.mxu0  ;;  %1557 = vmatpush3.msra.mxu1 %v644_v21  ;;  %1560 = vmatprep.mubr.msk.f32.mxu1 %vm232_vm0, %v1490_v32 }
 0x16c   : > { %v909_v28 = vmul.f32 %v907_v22, %v345_v50  ;;  %v1176_v29 = vmax.f32 %v1174_v23, 0.0  ;;  %v1173_v30 = vmul.f32 %v1666_v27, %v1148_v25  ;;  %v912_v36 = vadd.f32 %v910_v24, %v351_v58  ;;  %1558 = vmatprep.subr.mxu1 %v643_v33 }
 0x16d   : > { %1559 = vmatpush3.msra.mxu1 %v643_v33 }
 0x16e   : > { %v1178_v34 = vmul.f32 %v1176_v29, %v345_v50  ;;  %v1175_v37 = vmax.f32 %v1173_v30, 0.0  ;;  %v911_v38 = vadd.f32 %v909_v28, %v351_v58  ;;  %1561 = vmatmul.mubr.msk.f32.vlgmr.msra.gmra.mxu1 %vm232_vm0, %v1491_v39  ;;  %1570 = vmatprep.subr.mxu1 %v912_v36  ;;  %v432_v39 = vrot.slane %v1888_v14, %v431_v26 }
 0x16f   : > { %1571 = vmatpush3.msra.mxu1 %v912_v36  ;;  %1574 = vmatprep.mubr.msk.f32.mxu1 %vm232_vm0, %v1494_v41 }
 0x170   : > { %v1177_v5 = vmul.f32 %v1175_v37, %v345_v50  ;;  %v1180_v31 = vadd.f32 %v1178_v34, %v351_v58  ;;  %1572 = vmatprep.subr.mxu1 %v911_v38  ;;  %v434_v41 = vmul.f32 %v432_v39, %v341_v54  ;;  %v721_v44 = vmul.f32 %v640_v1, %v432_v39 }
 0x171   : > { %1573 = vmatpush3.msra.mxu1 %v911_v38  ;;  %v720_v43 = vmul.f32 %v639_v9, %v432_v39  ;;  %v989_v50 = vmul.f32 %v908_v19, %v432_v39  ;;  %v988_v53 = vmul.f32 %v907_v22, %v432_v39  ;;  %v1257_v56 = vmul.f32 %v1176_v29, %v432_v39 }
 0x172   : > { %v1179_v32 = vadd.f32 %v1177_v5, %v351_v58  ;;  %1575 = vmatmul.mubr.msk.f32.vlgmr.msra.gmra.mxu1 %vm232_vm0, %v1495_v47  ;;  %1584 = vmatprep.subr.mxu1 %v1180_v31  ;;  %v438_v47 = vrot.slane %v1888_v14, %v437_v35  ;;  %v1256_v58 = vmul.f32 %v1175_v37, %v432_v39 }
 0x173   : > { %1585 = vmatpush3.msra.mxu1 %v1180_v31  ;;  %1588 = vmatprep.mubr.msk.f32.mxu1 %vm232_vm0, %v1498_v48  ;;  %v433_v48 = vmul.f32 %v432_v39, %v340_v60 }
 0x174   : > { %1586 = vmatprep.subr.mxu1 %v1179_v32  ;;  %v440_v40 = vadd.f32 %v438_v47, %v434_v41  ;;  %v723_v46 = vadd.f32 %v721_v44, %v438_v47  ;;  %v722_v52 = vadd.f32 %v720_v43, %v438_v47  ;;  %v991_v54 = vadd.f32 %v989_v50, %v438_v47 }
 0x175   : > { %1587 = vmatpush3.msra.mxu1 %v1179_v32  ;;  %v439_v42 = vadd.f32 %v438_v47, %v433_v48  ;;  %v990_v55 = vadd.f32 %v988_v53, %v438_v47  ;;  %v1259_v60 = vadd.f32 %v1257_v56, %v438_v47  ;;  %v1258_v62 = vadd.f32 %v1256_v58, %v438_v47 }
 0x176   : > { %1589 = vmatmul.mubr.msk.f32.vlgmr.msra.gmra.mxu1 %vm232_vm0, %v1499_v51  ;;  %v1428_v51 = vmul.f32 -1.442695, %v440_v40  ;;  %v1442_v49 = vmul.f32 -1.442695, %v723_v46  ;;  %v1441_v57 = vmul.f32 -1.442695, %v722_v52 }
 0x177   : > { %v1427_v45 = vmul.f32 -1.442695, %v439_v42  ;;  %v1457_v59 = vmul.f32 -1.442695, %v991_v54  ;;  %v1456_v61 = vmul.f32 -1.442695, %v990_v55 }
 0x178   : > { %1667 = vpow2.f32 %v1428_v51  ;;  %v1472_v63 = vmul.f32 -1.442695, %v1259_v60  ;;  %v1471_v0 = vmul.f32 -1.442695, %v1258_v62 }
 0x179   : > { %1669 = vpow2.f32 %v1427_v45 }
 0x17a   : > { %1671 = vpow2.f32 %v1442_v49 }
 0x17b   : > { %1673 = vpow2.f32 %v1441_v57 }
 0x17c   : > { %1675 = vpow2.f32 %v1457_v59 }
 0x17d   : > { %1677 = vpow2.f32 %v1456_v61 }
 0x17e   : > { %1679 = vpow2.f32 %v1472_v63 }
 0x17f   : > { %1681 = vpow2.f32 %v1471_v0 }
 0x185   : > { %v1668_v1 = vpop.eup %1667 }
 0x186   : > { %v1670_v2 = vpop.eup %1669  ;;  %v448_v3 = vadd.f32 1.0, %v1668_v1 }
 0x187   : > { %v447_v4 = vadd.f32 1.0, %v1670_v2  ;;  %v1672_v6 = vpop.eup %1671 }
 0x188   : > { %1683 = vrcp.f32 %v448_v3  ;;  %v1674_v7 = vpop.eup %1673  ;;  %v731_v8 = vadd.f32 1.0, %v1672_v6  ;;  %v201_v3 = vld [vmem:[%s2117_s2 + $0x8] sm:$0xff] }
 0x189   : > { %1685 = vrcp.f32 %v447_v4  ;;  %v1676_v9 = vpop.eup %1675  ;;  %v730_v10 = vadd.f32 1.0, %v1674_v7 }
 0x18a   : > { %v1678_v11 = vpop.eup %1677  ;;  %1687 = vrcp.f32 %v731_v8  ;;  %v999_v15 = vadd.f32 1.0, %v1676_v9 }
 0x18b   : > { %v1680_v16 = vpop.eup %1679  ;;  %1689 = vrcp.f32 %v730_v10  ;;  %v998_v17 = vadd.f32 1.0, %v1678_v11 }
 0x18c   : > { %v1682_v18 = vpop.eup %1681  ;;  %1691 = vrcp.f32 %v999_v15  ;;  %v1267_v19 = vadd.f32 1.0, %v1680_v16 }
 0x18d   : > { %1693 = vrcp.f32 %v998_v17  ;;  %v1266_v20 = vadd.f32 1.0, %v1682_v18 }
 0x18e   : > { %1695 = vrcp.f32 %v1267_v19 }
 0x18f   : > { %1697 = vrcp.f32 %v1266_v20 }
 0x195   : > { %v1684_v21 = vpop.eup %1683 }
 0x196   : > { %v1686_v24 = vpop.eup %1685 }
 0x197   : > { %v1688_v30 = vpop.eup %1687 }
 0x198   : > { %v1690_v37 = vpop.eup %1689 }
 0x199   : > { %v1692_v32 = vpop.eup %1691 }
 0x19a   : > { %v1694_v48 = vpop.eup %1693 }
 0x19b   : > { %v1696_v43 = vpop.eup %1695 }
 0x19c   : > { %v1698_v54 = vpop.eup %1697 }
 0x22a   : > { %v1548_v22 = vpop.f32.mrf.mxu1 }
 0x22b   : > { %v454_v23 = vmul.f32 %v1684_v21, %v1548_v22 }
 0x22c   : > { %v420_v25 = vpop.f32.mrf.mxu1 }
 0x22d   : > { %v453_v27 = vmul.f32 %v1686_v24, %v420_v25  ;;  %v456_v28 = vmax.f32 %v454_v23, 0.0 }
 0x22e   : > { %v1562_v33 = vpop.f32.mrf.mxu1 }
 0x22f   : > { %v455_v29 = vmax.f32 %v453_v27, 0.0  ;;  %v737_v36 = vmul.f32 %v1688_v30, %v1562_v33 }
 0x230   : > { %v711_v38 = vpop.f32.mrf.mxu1 }
 0x231   : > { %v457_v34 = vadd.f32 %v456_v28, %v455_v29  ;;  %v736_v31 = vmul.f32 %v1690_v37, %v711_v38  ;;  %v739_v35 = vmax.f32 %v737_v36, 0.0  ;;  %v471_v37 = vrot.slane %v201_v3, 1 }
 0x232   : > { %v1576_v26 = vpop.f32.mrf.mxu1  ;;  %v475_v38 = vrot.slane %v1888_v14, 2 }
 0x233   : > { %v458_v5 = vrot.slane %v457_v34, 4  ;;  %v738_v41 = vmax.f32 %v736_v31, 0.0  ;;  %v1005_v47 = vmul.f32 %v1692_v32, %v1576_v26  ;;  %v478_v32 = vrot.slane %v1888_v14, 3 }
 0x234   : > { %v979_v40 = vpop.f32.mrf.mxu1  ;;  %v490_v26 = vrot.slane %v1888_v14, 7 }
 0x235   : > { %v459_v39 = vadd.f32 %v458_v5, %v457_v34  ;;  %v740_v44 = vadd.f32 %v739_v35, %v738_v41  ;;  %v1004_v51 = vmul.f32 %v1694_v48, %v979_v40  ;;  %v1007_v45 = vmax.f32 %v1005_v47, 0.0 }
 0x236   : > { %v1590_v46 = vpop.f32.mrf.mxu1  ;;  %v487_v5 = vrot.slane %v1888_v14, 6 }
 0x237   : > { %v460_v42 = vrot.slane %v459_v39, 2  ;;  %v741_v50 = vrot.slane %v740_v44, 4  ;;  %v1006_v52 = vmax.f32 %v1004_v51, 0.0  ;;  %v1273_v53 = vmul.f32 %v1696_v43, %v1590_v46 }
 0x238   : > { %v1247_v56 = vpop.f32.mrf.mxu1 }
 0x239   : > { %v461_v49 = vadd.f32 %v460_v42, %v459_v39  ;;  %v742_v57 = vadd.f32 %v741_v50, %v740_v44  ;;  %v1008_v55 = vadd.f32 %v1007_v45, %v1006_v52  ;;  %v1272_v58 = vmul.f32 %v1698_v54, %v1247_v56 }
 0x23a   : > { %v1275_v62 = vmax.f32 %v1273_v53, 0.0 }
 0x23b   : > { %v462_v59 = vrot.slane %v461_v49, 1  ;;  %v743_v60 = vrot.slane %v742_v57, 2  ;;  %v1009_v61 = vrot.slane %v1008_v55, 4  ;;  %v1274_v63 = vmax.f32 %v1272_v58, 0.0 }
 0x23d   : > { %v463_v0 = vadd.f32 %v462_v59, %v461_v49  ;;  %v1010_v1 = vadd.f32 %v1009_v61, %v1008_v55  ;;  %v1276_v2 = vadd.f32 %v1275_v62, %v1274_v63  ;;  %v744_v4 = vadd.f32 %v743_v60, %v742_v57 }
 0x23f   : > { %v464_v6 = vmul.f32 0.0625, %v463_v0  ;;  %v1011_v7 = vrot.slane %v1010_v1, 2  ;;  %v1277_v8 = vrot.slane %v1276_v2, 4  ;;  %v745_v9 = vrot.slane %v744_v4, 1 }
 0x241   : > { %v465_v10 = vmul.f32 %v464_v6, %v201_v3  ;;  %v1278_v11 = vadd.f32 %v1277_v8, %v1276_v2  ;;  %v746_v15 = vadd.f32 %v745_v9, %v744_v4  ;;  %v1012_v16 = vadd.f32 %v1011_v7, %v1010_v1 }
 0x243   : > { %v467_v17 = vsel %vm466_vm1, %v465_v10, 0.0  ;;  %v1279_v18 = vrot.slane %v1278_v11, 2  ;;  %v747_v19 = vmul.f32 0.0625, %v746_v15  ;;  %v1013_v20 = vrot.slane %v1012_v16, 1 }
 0x244   : > { %468 = vadd.xlane.f32.xlu0 %v467_v17 }
 0x245   : > { %v748_v21 = vmul.f32 %v747_v19, %v201_v3  ;;  %v1014_v22 = vadd.f32 %v1013_v20, %v1012_v16  ;;  %v1280_v23 = vadd.f32 %v1279_v18, %v1278_v11 }
 0x247   : > { %v749_v24 = vsel %vm466_vm1, %v748_v21, 0.0  ;;  %v1015_v25 = vmul.f32 0.0625, %v1014_v22  ;;  %v1281_v27 = vrot.slane %v1280_v23, 1 }
 0x248   : > { %750 = vadd.xlane.f32.xlu1 %v749_v24 }
 0x249   : > { %v1016_v28 = vmul.f32 %v1015_v25, %v201_v3  ;;  %v1282_v29 = vadd.f32 %v1281_v27, %v1280_v23 }
 0x24b   : > { %v1017_v30 = vsel %vm466_vm1, %v1016_v28, 0.0  ;;  %v1283_v33 = vmul.f32 0.0625, %v1282_v29 }
 0x24c   : > { %1018 = vadd.xlane.f32.xlu0 %v1017_v30 }
 0x24d   : > { %v1284_v34 = vmul.f32 %v1283_v33, %v201_v3 }
 0x24f   : > { %v1285_v36 = vsel %vm466_vm1, %v1284_v34, 0.0 }
 0x250   : > { %1286 = vadd.xlane.f32.xlu0 %v1285_v36 }
 0x2cd   : > { %v469_v31 = vpop.xlane.xlu0 %468 }
 0x2ce   : > { %v2003_v39 = vadd.f32 %v471_v37, %v469_v31 }
 0x2d0   : > { %v477_v35 = vmul.f32 %v475_v38, %v2003_v39  ;;  %v489_v41 = vmul.f32 %v487_v5, %v2003_v39  ;;  %v515_v30 = vrot.slane %v2003_v39, %v1883_v13 }
 0x2d1   : > { %v751_v40 = vpop.xlane.xlu1 %750 }
 0x2d2   : > { %v480_v47 = vadd.f32 %v478_v32, %v477_v35  ;;  %v492_v48 = vadd.f32 %v490_v26, %v489_v41  ;;  %v2007_v42 = vadd.f32 %v751_v40, %v471_v37 }
 0x2d4   : > { %v1429_v44 = vmul.f32 -1.442695, %v480_v47  ;;  %v1430_v51 = vmul.f32 -1.442695, %v492_v48  ;;  %v753_v43 = vmul.f32 %v2007_v42, %v475_v38  ;;  %v761_v45 = vmul.f32 %v2007_v42, %v487_v5 }
 0x2d5   : > { %v1019_v46 = vpop.xlane.xlu0 %1018 }
 0x2d6   : > { %1699 = vpow2.f32 %v1429_v44  ;;  %v754_v14 = vadd.f32 %v753_v43, %v478_v32  ;;  %v762_v50 = vadd.f32 %v761_v45, %v490_v26  ;;  %v2011_v52 = vadd.f32 %v1019_v46, %v471_v37 }
 0x2d7   : > { %1701 = vpow2.f32 %v1430_v51 }
 0x2d8   : > { %v1443_v53 = vmul.f32 -1.442695, %v754_v14  ;;  %v1444_v49 = vmul.f32 -1.442695, %v762_v50  ;;  %v1021_v54 = vmul.f32 %v2011_v52, %v475_v38  ;;  %v1029_v56 = vmul.f32 %v2011_v52, %v487_v5 }
 0x2d9   : > { %v1287_v57 = vpop.xlane.xlu0 %1286  ;;  %v1050_v51 = vrot.slane %v2011_v52, %v1883_v13 }
 0x2da   : > { %1703 = vpow2.f32 %v1443_v53  ;;  %v1022_v55 = vadd.f32 %v1021_v54, %v478_v32  ;;  %v1030_v58 = vadd.f32 %v1029_v56, %v490_v26  ;;  %v2015_v59 = vadd.f32 %v1287_v57, %v471_v37 }
 0x2db   : > { %1705 = vpow2.f32 %v1444_v49 }
 0x2dc   : > { %v1458_v60 = vmul.f32 -1.442695, %v1022_v55  ;;  %v1459_v61 = vmul.f32 -1.442695, %v1030_v58  ;;  %v1289_v62 = vmul.f32 %v2015_v59, %v475_v38  ;;  %v1297_v63 = vmul.f32 %v2015_v59, %v487_v5 }
 0x2dd   : > { %v1318_v52 = vrot.slane %v2015_v59, %v1883_v13 }
 0x2de   : > { %1707 = vpow2.f32 %v1458_v60  ;;  %v1290_v0 = vadd.f32 %v1289_v62, %v478_v32  ;;  %v1298_v1 = vadd.f32 %v1297_v63, %v490_v26  ;;  %v782_v26 = vrot.slane %v2007_v42, %v1883_v13 }
 0x2df   : > { %1709 = vpow2.f32 %v1459_v61 }
 0x2e0   : > { %v1473_v2 = vmul.f32 -1.442695, %v1290_v0  ;;  %v1474_v3 = vmul.f32 -1.442695, %v1298_v1 }
 0x2e2   : > { %1711 = vpow2.f32 %v1473_v2 }
 0x2e3   : > { %v1700_v4 = vpop.eup %1699  ;;  %1713 = vpow2.f32 %v1474_v3 }
 0x2e4   : > { %v1702_v6 = vpop.eup %1701  ;;  %v484_v7 = vadd.f32 1.0, %v1700_v4 }
 0x2e5   : > { %v496_v8 = vadd.f32 1.0, %v1702_v6 }
 0x2e6   : > { %1715 = vrcp.f32 %v484_v7 }
 0x2e7   : > { %1717 = vrcp.f32 %v496_v8  ;;  %v1704_v9 = vpop.eup %1703 }
 0x2e8   : > { %v1706_v10 = vpop.eup %1705  ;;  %v758_v11 = vadd.f32 1.0, %v1704_v9 }
 0x2e9   : > { %v766_v15 = vadd.f32 1.0, %v1706_v10 }
 0x2ea   : > { %1719 = vrcp.f32 %v758_v11 }
 0x2eb   : > { %v1708_v16 = vpop.eup %1707  ;;  %1721 = vrcp.f32 %v766_v15 }
 0x2ec   : > { %v1710_v17 = vpop.eup %1709  ;;  %v1026_v18 = vadd.f32 1.0, %v1708_v16 }
 0x2ed   : > { %v1034_v19 = vadd.f32 1.0, %v1710_v17 }
 0x2ee   : > { %1723 = vrcp.f32 %v1026_v18 }
 0x2ef   : > { %v1712_v20 = vpop.eup %1711  ;;  %1725 = vrcp.f32 %v1034_v19 }
 0x2f0   : > { %v1714_v21 = vpop.eup %1713  ;;  %v1294_v22 = vadd.f32 1.0, %v1712_v20 }
 0x2f1   : > { %v1302_v23 = vadd.f32 1.0, %v1714_v21 }
 0x2f2   : > { %1727 = vrcp.f32 %v1294_v22 }
 0x2f3   : > { %v1716_v24 = vpop.eup %1715  ;;  %1729 = vrcp.f32 %v1302_v23 }
 0x2f4   : > { %v1718_v25 = vpop.eup %1717  ;;  %v510_v27 = vrot.slane %v1716_v24, %v1883_v13 }
 0x2f5   : > { %v505_v28 = vrot.slane %v1718_v25, %v1883_v13 }
 0x2f7   : > { %v506_v29 = vsel %vm501_vm2, %v505_v28, 0.0  ;;  %v1720_v33 = vpop.eup %1719 }
 0x2f8   : > { %v511_v34 = vsel %vm500_vm3, %v510_v27, %v506_v29  ;;  %v1722_v36 = vpop.eup %1721  ;;  %v777_v38 = vrot.slane %v1720_v33, %v1883_v13 }
 0x2f9   : > { %v516_v37 = vsel %vm499_vm4, %v515_v30, %v511_v34  ;;  %v772_v5 = vrot.slane %v1722_v36, %v1883_v13 }
 0x2fa   : > { %517 = vst [vmem:[%s184_s17] sm:$0xff] %v516_v37 }
 0x2fb   : > { %v1724_v31 = vpop.eup %1723  ;;  %v773_v32 = vsel %vm501_vm2, %v772_v5, 0.0 }
 0x2fc   : > { %v1726_v39 = vpop.eup %1725  ;;  %v778_v35 = vsel %vm500_vm3, %v777_v38, %v773_v32  ;;  %v1045_v41 = vrot.slane %v1724_v31, %v1883_v13 }
 0x2fd   : > { %v783_v47 = vsel %vm499_vm4, %v782_v26, %v778_v35  ;;  %v1040_v48 = vrot.slane %v1726_v39, %v1883_v13 }
 0x2fe   : > { %1445 = vst [vmem:[%s184_s17 + $0x8] sm:$0xff] %v783_v47 }
 0x2ff   : > { %v1728_v40 = vpop.eup %1727  ;;  %v1041_v44 = vsel %vm501_vm2, %v1040_v48, 0.0 }
 0x300   : > { %v1730_v42 = vpop.eup %1729  ;;  %v1046_v43 = vsel %vm500_vm3, %v1045_v41, %v1041_v44  ;;  %v1313_v45 = vrot.slane %v1728_v40, %v1883_v13 }
 0x301   : > { %v1051_v46 = vsel %vm499_vm4, %v1050_v51, %v1046_v43  ;;  %v1308_v14 = vrot.slane %v1730_v42, %v1883_v13 }
 0x302   : > { %1460 = vst [vmem:[%s184_s17 + $0x10] sm:$0xff] %v1051_v46 }
 0x303   : > { %v1309_v50 = vsel %vm501_vm2, %v1308_v14, 0.0 }
 0x304   : > { %v1314_v53 = vsel %vm500_vm3, %v1313_v45, %v1309_v50 }
 0x305   : > { %v1319_v49 = vsel %vm499_vm4, %v1318_v52, %v1314_v53 }
 0x306   : > { %1475 = vst [vmem:[%s184_s17 + $0x18] sm:$0xff] %v1319_v49 }
 0x307   : > { %1744 = shalt.err (!%p1741_p3)
}
 0x308   : > { %s1745_s4 = scalar_lea.hbm %s2065_s26, 512  ;;  %s1749_s7 = scalar_lea.hbm %s2118_s3, 1024 }
 0x309   : > { %p1746_p4 = scmp.ne.s32.totalorder %s2065_s26, %s1745_s4  ;;  %p1750_p9 = scmp.lt.s32.totalorder %s2065_s26, %s2118_s3 }
 0x30a   : > { %p1751_p10 = scmp.lt.s32.totalorder %s1749_s7, %s1745_s4 }
 0x30b   : > { %p1747_p7 = pnand %p1746_p4, %p1855_p5 }
 0x30c   : > { %p1752_p11 = por %p1751_p10, %p1750_p9 }
 0x30d   : > { %p1748_p8 = pneg %p1747_p7 }
 0x30f   : > { %p1753_p12 = pnand %p1752_p11, %p1748_p8 }
 0x311   : > { %1756 = shalt.err (!%p1753_p12)
}
 0x312   : > { %s1795_s10 = smov 128   ;;  %s1796_s11 = smov 8  }
 0x313   : > { %1591 = dma.vmem_to_hbm [thread:$0]  (%p1855_p5), %s2067_s20, 512, %s2065_s26, %s2075_s16, %s1795_s10, %s1795_s10, %s1796_s11  }
 0x314 PF: > { %p1597_p13 = scmp.ge.s32.totalorder %s1791_s15, 2  ;;  %s1351_s17 = sand.u32 1, %s1779_s12  }
 0x315   : > { %s1352_s19 = scalar_lea.sflag [#allocation3], %s1351_s17 }
 0x316   : > { %p1594_p0 = pnand %p1597_p13, %p1859_p6 }
 0x318   : > { %p1595_p1 = pneg %p1594_p0 }
 0x31a   : > { %1774 = dma.done.wait (%p1595_p1), %s1352_s19, 512  }
 0x31b   : > { %1776 = vsyncadd (%p1595_p1), %s1352_s19, 4294966784  ;;  %p13_p2 = scmp.ge.s32.totalorder %s1842_s18, 4   ;;  %s2121_s12 = smov %s1783_s13 }
 0x31c   : > { %s2122_s13 = smov %s1787_s14  ;;  %s2123_s14 = smov %s1853_s21 }
 0x31d   : > { %s2124_s15 = smov %s1842_s18  ;;  %15 = sbr.rel (!%p13_p2) target bundleno = 3 (0x3), region = 79 }
 0x322   :  { %1357 = vsyncpa [#allocation3], 1 }
 0x323   :  { %1359 = vsyncpa [#allocation3 + $0x1], 1 }

</bundles_post_ra>
